<compile_context>
chip_gen: v6e
topology: v6e:2x2x1
jax: 0.10.0
libtpu: 0.0.40
codegen_flags: <defaults>
</compile_context>

<pallas_src>
import numpy as np
import jax
import jax.numpy as jnp
from jax import lax
from jax.experimental import pallas as pl
from jax.experimental.pallas import tpu as pltpu

LANES = 128
SUBLANES = 8


def _round_up(x, m):
    return (x + m - 1) // m * m


# ----------------------------------------------------------------------------
# Kernel 1: fused conv (im2col matmul) + bias + 2x2/2 max-pool + ReLU
# ----------------------------------------------------------------------------
def _conv_pool_relu_kernel(x_ref, w_ref, b_ref, o_ref):
    """x_ref: (4, TM, K) -- the four 2x2 pool-window positions of TM pooled
    output pixels.  relu(max_4(x_i @ w) + b) == relu(maxpool(conv + b)):
    the per-channel bias and the (monotone) ReLU commute with the max."""
    w = w_ref[...]
    y0 = jnp.dot(x_ref[0], w, preferred_element_type=jnp.float32)
    y1 = jnp.dot(x_ref[1], w, preferred_element_type=jnp.float32)
    y2 = jnp.dot(x_ref[2], w, preferred_element_type=jnp.float32)
    y3 = jnp.dot(x_ref[3], w, preferred_element_type=jnp.float32)
    m = jnp.maximum(jnp.maximum(y0, y1), jnp.maximum(y2, y3))
    o_ref[...] = jnp.maximum(m + b_ref[...], 0.0).astype(o_ref.dtype)


def conv_pool_relu(patches4, w, b, *, block_m=512, out_dtype=jnp.bfloat16):
    """relu(maxpool2x2(conv + b)) with the pool fused into the matmul epilogue.

    patches4 : (4, Mp, K) bf16  pool-window-arranged im2col patches
    w        : (K, Cp)    bf16  im2col conv weight, Cout lane-padded to 128
    b        : (1, Cp)    f32
    Output   : (Mp, Cp) lane-dense bf16 (rows ordered (b, h_pooled, w_pooled)).
    The M grid axis is 'parallel'; at demo size it collapses to one tile."""
    four, Mp, K = patches4.shape
    Kw, Cp = w.shape
    assert four == 4 and Kw == K and Cp % LANES == 0 and b.shape == (1, Cp)
    assert Mp % SUBLANES == 0
    block_m = min(block_m, Mp)
    if Mp % block_m:
        block_m = Mp
    return pl.pallas_call(
        _conv_pool_relu_kernel,
        grid=(Mp // block_m,),
        out_shape=jax.ShapeDtypeStruct((Mp, Cp), out_dtype),
        in_specs=[
            pl.BlockSpec((4, block_m, K), lambda i: (0, i, 0)),
            pl.BlockSpec((K, Cp), lambda i: (0, 0)),
            pl.BlockSpec((1, Cp), lambda i: (0, 0)),
        ],
        out_specs=pl.BlockSpec((block_m, Cp), lambda i: (i, 0)),
        compiler_params=pltpu.CompilerParams(
            dimension_semantics=("parallel",)),
    )(patches4, w, b)


# ----------------------------------------------------------------------------
# Kernel 2: tiled fc1 (+ReLU), optionally with fc2 (+ReLU) fused in finalise
# ----------------------------------------------------------------------------
def _fc1_kernel(x_ref, w_ref, b_ref, o_ref, acc_ref):
    @pl.when(pl.program_id(2) == 0)
    def _init():
        acc_ref[...] = jnp.zeros_like(acc_ref)

    acc_ref[...] += jnp.dot(x_ref[...], w_ref[...],
                            preferred_element_type=jnp.float32)

    @pl.when(pl.program_id(2) == pl.num_programs(2) - 1)
    def _finalize():
        o_ref[...] = jnp.maximum(acc_ref[...] + b_ref[...],
                                 0.0).astype(o_ref.dtype)


def _fc1_fc2_kernel(x_ref, w1_ref, b1_ref, w2_ref, b2_ref, o_ref, acc_ref):
    @pl.when(pl.program_id(2) == 0)
    def _init():
        acc_ref[...] = jnp.zeros_like(acc_ref)

    acc_ref[...] += jnp.dot(x_ref[...], w1_ref[...],
                            preferred_element_type=jnp.float32)

    @pl.when(pl.program_id(2) == pl.num_programs(2) - 1)
    def _finalize():
        h = jnp.maximum(acc_ref[...] + b1_ref[...], 0.0).astype(jnp.bfloat16)
        y = jnp.dot(h, w2_ref[...], preferred_element_type=jnp.float32)
        o_ref[...] = jnp.maximum(y + b2_ref[...], 0.0).astype(o_ref.dtype)


def fc_head(x2d, w1, b1, w2=None, b2=None, *, block_n, block_k,
            vmem_limit_bytes, out_dtype):
    """Tiled relu(x @ w1 + b1), optionally followed in-kernel by
    relu(. @ w2 + b2) when the whole hidden fits in one N tile (single-TC path).

    Grid is (M, N, K) with K (reduction) trailing/'arbitrary' and a f32 VMEM
    accumulator.  For the real 755904-K fc1, block_k should be a large multiple
    of 256 so weight DMAs sit in the streaming regime and the 256-deep MXU is
    filled; block_n/vmem_limit are sized per generation by the caller."""
    B, K = x2d.shape
    Kw, Np = w1.shape
    assert Kw == K and Np % LANES == 0 and b1.shape == (1, Np)
    block_n = min(block_n, Np)
    if Np % block_n:
        block_n = Np
    block_k = min(block_k, K)
    if K % block_k:
        block_k = K
    n_tiles, k_tiles = Np // block_n, K // block_k

    common = dict(
        grid=(1, n_tiles, k_tiles),
        scratch_shapes=[pltpu.VMEM((B, block_n), jnp.float32)],
        compiler_params=pltpu.CompilerParams(
            dimension_semantics=("parallel", "parallel", "arbitrary"),
            vmem_limit_bytes=vmem_limit_bytes),
    )
    x_spec = pl.BlockSpec((B, block_k), lambda m, n, k: (m, k))
    w1_spec = pl.BlockSpec((block_k, block_n), lambda m, n, k: (k, n))
    b1_spec = pl.BlockSpec((1, block_n), lambda m, n, k: (0, n))

    if w2 is None:
        return pl.pallas_call(
            _fc1_kernel,
            out_shape=jax.ShapeDtypeStruct((B, Np), out_dtype),
            in_specs=[x_spec, w1_spec, b1_spec],
            out_specs=pl.BlockSpec((B, block_n), lambda m, n, k: (m, n)),
            **common)(x2d, w1, b1)

    assert n_tiles == 1, "fc2 fusion needs the full hidden in one N tile"
    Hp, Op = w2.shape
    assert Hp == Np and Op % LANES == 0 and b2.shape == (1, Op)
    return pl.pallas_call(
        _fc1_fc2_kernel,
        out_shape=jax.ShapeDtypeStruct((B, Op), out_dtype),
        in_specs=[x_spec, w1_spec, b1_spec,
                  pl.BlockSpec((Hp, Op), lambda m, n, k: (0, 0)),
                  pl.BlockSpec((1, Op), lambda m, n, k: (0, 0))],
        out_specs=pl.BlockSpec((B, Op), lambda m, n, k: (m, 0)),
        **common)(x2d, w1, b1, w2, b2)


# ----------------------------------------------------------------------------
# Kernel 3: small single-block matmul + bias + ReLU (standalone fc2, v7x path)
# ----------------------------------------------------------------------------
def _matmul_bias_relu_kernel(x_ref, w_ref, b_ref, o_ref):
    acc = jnp.dot(x_ref[...], w_ref[...], preferred_element_type=jnp.float32)
    o_ref[...] = jnp.maximum(acc + b_ref[...], 0.0).astype(o_ref.dtype)


def matmul_bias_relu(x, w, b, *, out_dtype=jnp.bfloat16):
    M, K = x.shape
    K2, Np = w.shape
    assert K == K2 and Np % LANES == 0 and b.shape == (1, Np)
    return pl.pallas_call(
        _matmul_bias_relu_kernel,
        grid=(1,),
        out_shape=jax.ShapeDtypeStruct((M, Np), out_dtype),
        in_specs=[pl.BlockSpec((M, K), lambda i: (0, 0)),
                  pl.BlockSpec((K, Np), lambda i: (0, 0)),
                  pl.BlockSpec((1, Np), lambda i: (0, 0))],
        out_specs=pl.BlockSpec((M, Np), lambda i: (0, 0)),
    )(x, w, b)


# ----------------------------------------------------------------------------
# Layout plumbing (XLA side, negligible at demo size)
# ----------------------------------------------------------------------------
def _pool_window_patches(patches, dtype=jnp.bfloat16):
    """Arrange im2col patches (B, Hc, Wc, K) of a stride-2 conv into the four
    positions of the F.pad((0,0,1,1)) + MaxPool2d(2,2) that follows the conv.

    Pool rows falling on the zero-pad rows are replaced by a duplicate of the
    in-range row of the same window; exact because ReLU follows the pool, so a
    literal 0 pad element can never change relu(max(window)).  Returns
    (4, Mp, K) with Mp = round_up(B*H2*W2, 8); callers slice off the pad rows."""
    B, Hc, Wc, K = patches.shape
    H2, W2 = (Hc + 2) // 2, Wc // 2
    rows = np.clip(2 * np.arange(H2)[:, None] + np.arange(2)[None, :] - 1,
                   0, Hc - 1)                                   # (H2, 2) static
    g = jnp.take(patches, jnp.asarray(rows.reshape(-1)), axis=1)
    g = g.reshape(B, H2, 2, Wc, K)[:, :, :, :2 * W2, :]
    g = g.reshape(B, H2, 2, W2, 2, K)
    g = jnp.transpose(g, (2, 4, 0, 1, 3, 5)).reshape(4, B * H2 * W2, K)
    M = B * H2 * W2
    Mp = _round_up(M, SUBLANES)
    if Mp != M:
        g = jnp.pad(g, ((0, 0), (0, Mp - M), (0, 0)))
    return g.astype(dtype), (H2, W2, M)


def _flatten_geometry(H, W, channel_2):
    """Replicates the shape arithmetic of forward(); returns (H4, W4, fdim)."""
    conv_out = lambda n, k, s: (n - k) // s + 1
    H1, W1 = conv_out(H + 4, 3, 2), conv_out(W, 3, 2)
    H2, W2 = (H1 + 2) // 2, W1 // 2
    H3, W3 = conv_out(H2 + 4, 3, 2), conv_out(W2 + 1, 3, 2)
    H4, W4 = (H3 + 2) // 2, W3 // 2
    return H4, W4, channel_2 * H4 * W4


def _im2col_weight(w_oihw, cin_pad, lhs_spec):
    """Flatten a PyTorch (O, I, kh, kw) conv weight into an im2col operand
    (I_pad*kh*kw, O) whose row ordering matches the activation patches, by
    running the same conv_general_dilated_patches op on the weight itself."""
    O, I, kh, kw = w_oihw.shape
    w = jnp.pad(w_oihw, ((0, 0), (0, cin_pad - I), (0, 0), (0, 0)))
    if lhs_spec == "NHWC":
        w = jnp.transpose(w, (0, 2, 3, 1))
        dn = ("NHWC", "OIHW", "NHWC")
    else:
        dn = ("NCHW", "OIHW", "NHWC")
    rows = lax.conv_general_dilated_patches(w, (kh, kw), (1, 1), "VALID",
                                            dimension_numbers=dn)
    return rows.reshape(O, cin_pad * kh * kw).T


def _pack_params(params, x_shape):
    """Zero-pad matmul output dims to 128 lanes, cast MXU operands to bf16.
    fc1 is packed as a plain 2-D (S*C2p, hidden_p) matrix whose row order
    matches the kernel's (h, w, c_pad) flatten.  Done once, offline, in prod."""
    _, Cin, H, W = x_shape
    w1, b1 = params["w1"], params["b1"]
    w2, b2 = params["w2"], params["b2"]
    wf1, bf1 = params["wf1"], params["bf1"]
    wf2, bf2 = params["wf2"], params["bf2"]

    C1, C2 = w1.shape[0], w2.shape[0]
    C1p, C2p = _round_up(C1, LANES), _round_up(C2, LANES)

    # TODO(synk): conv1's im2col K (=Cin*9=27) underfills the MXU contraction;
    # only worth padding/re-batching taps at real image sizes.
    w1m = jnp.pad(_im2col_weight(w1, Cin, "NCHW"),
                  ((0, 0), (0, C1p - C1))).astype(jnp.bfloat16)
    b1p = jnp.pad(b1, (0, C1p - C1)).reshape(1, C1p).astype(jnp.float32)

    w2m = jnp.pad(_im2col_weight(w2, C1p, "NHWC"),
                  ((0, 0), (0, C2p - C2))).astype(jnp.bfloat16)
    b2p = jnp.pad(b2, (0, C2p - C2)).reshape(1, C2p).astype(jnp.float32)

    H4, W4, fdim = _flatten_geometry(H, W, C2)
    hidden = wf1.shape[1]
    hidden_p = _round_up(hidden, LANES)
    assert wf1.shape[0] == fdim, (wf1.shape, fdim)
    # PyTorch flattens NCHW (c, h, w); the kernel activation is (h, w, c_pad).
    wf1r = wf1.reshape(C2, H4, W4, hidden).transpose(1, 2, 0, 3)
    wf1r = jnp.pad(wf1r, ((0, 0), (0, 0), (0, C2p - C2), (0, hidden_p - hidden)))
    wf1m = wf1r.reshape(H4 * W4 * C2p, hidden_p).astype(jnp.bfloat16)
    bf1p = jnp.pad(bf1, (0, hidden_p - hidden)).reshape(1, hidden_p).astype(jnp.float32)

    n_out = wf2.shape[1]
    n_out_p = _round_up(n_out, LANES)
    wf2m = jnp.pad(wf2, ((0, hidden_p - hidden),
                         (0, n_out_p - n_out))).astype(jnp.bfloat16)
    bf2p = jnp.pad(bf2, (0, n_out_p - n_out)).reshape(1, n_out_p).astype(jnp.float32)

    return dict(w1m=w1m, b1p=b1p, w2m=w2m, b2p=b2p,
                wf1m=wf1m, bf1p=bf1p, wf2m=wf2m, bf2p=bf2p)


def _fc1_tuning(hidden_p):
    """Per-generation defaults for the fc1(+fc2) kernel."""
    kind = ""
    try:
        kind = jax.devices()[0].device_kind.lower()
    except Exception:
        pass
    if "v7" in kind or "7x" in kind:
        # v7x: 2 TensorCores/chip -> keep >=2 N tiles so the 'parallel' N axis
        # splits across cores; 64 MiB physical VMEM/TC -> cap the limit.
        return dict(block_n=max(hidden_p // 2, LANES), fuse_fc2=False,
                    vmem_limit_bytes=48 * 1024 * 1024)
    # v5e / v6e: single TC -> one N tile, fuse fc2 into the finalise, and allow
    # larger double-buffered weight tiles (128 MiB physical VMEM).
    return dict(block_n=hidden_p, fuse_fc2=True,
                vmem_limit_bytes=64 * 1024 * 1024)


# ----------------------------------------------------------------------------
# RegClassifier1 forward
# ----------------------------------------------------------------------------
def reg_classifier1_forward(x, params, *, block_k=None, block_n=None,
                            fuse_fc2=None, vmem_limit_bytes=None):
    """RegClassifier1.forward: NCHW float32 input, three Pallas TPU kernels."""
    B = x.shape[0]
    p = _pack_params(params, x.shape)
    n_out = params["wf2"].shape[1]
    hidden_p = p["wf1m"].shape[1]

    tune = _fc1_tuning(hidden_p)
    if block_n is None:
        block_n = tune["block_n"]
    if fuse_fc2 is None:
        fuse_fc2 = tune["fuse_fc2"]
    if vmem_limit_bytes is None:
        vmem_limit_bytes = tune["vmem_limit_bytes"]

    # block 1: F.pad(H+-2) -> conv1+bias -> F.pad(H+-1) -> maxpool -> relu,
    # all in ONE kernel (pool window exposed as 4 im2col matmuls).
    patches1 = lax.conv_general_dilated_patches(
        x, (3, 3), (2, 2), ((2, 2), (0, 0)),
        dimension_numbers=("NCHW", "OIHW", "NHWC"))          # (B, 17, 15, 27)
    g1, (H2, W2, M1) = _pool_window_patches(patches1)
    out1 = conv_pool_relu(g1, p["w1m"], p["b1p"])             # (Mp1, 128) bf16
    h1 = out1[:M1].reshape(B, H2, W2, -1)                     # NHWC, 128 lanes

    # block 2: F.pad(H+-2, W+1) -> conv2+bias -> F.pad(H+-1) -> maxpool -> relu,
    # writing the pooled activation directly (lane-dense bf16).
    patches2 = lax.conv_general_dilated_patches(
        h1, (3, 3), (2, 2), ((2, 2), (0, 1)),
        dimension_numbers=("NHWC", "OIHW", "NHWC"))           # (B, 6, 3, 1152)
    g2, (H4, W4, M2) = _pool_window_patches(patches2)
    out2 = conv_pool_relu(g2, p["w2m"], p["b2p"])             # (Mp2, 128) bf16

    # flatten -> fc1(+relu) as a plain tiled matmul; fc2(+relu) fused into the
    # finalise on single-TC chips, separate tiny kernel on v7x.
    assert M2 % B == 0
    x_fc = out2[:M2].reshape(B, (M2 // B) * out2.shape[-1])   # (B, S*C2p) bf16
    Kf = x_fc.shape[1]
    assert p["wf1m"].shape[0] == Kf, (p["wf1m"].shape, Kf)
    if block_k is None:
        # Real 755904-K fc1: use large multiples of 256 (1024-4096); the demo
        # K=512 uses 256 so the multi-K-step accumulation path is exercised.
        block_k = 256 if Kf <= 2048 else 2048

    if fuse_fc2 and block_n == hidden_p:
        out = fc_head(x_fc, p["wf1m"], p["bf1p"], p["wf2m"], p["bf2p"],
                      block_n=block_n, block_k=block_k,
                      vmem_limit_bytes=vmem_limit_bytes, out_dtype=jnp.float32)
    else:
        hidden = fc_head(x_fc, p["wf1m"], p["bf1p"],
                         block_n=block_n, block_k=block_k,
                         vmem_limit_bytes=vmem_limit_bytes,
                         out_dtype=jnp.bfloat16)
        out = matmul_bias_relu(hidden, p["wf2m"], p["bf2p"],
                               out_dtype=jnp.float32)
    return out[:, :n_out]


# ----------------------------------------------------------------------------
# Pure-JAX reference for a correctness check
# ----------------------------------------------------------------------------
def reference_forward(x, params):
    def conv(x, w, b, s):
        y = jax.lax.conv_general_dilated(
            x, w, (s, s), "VALID", dimension_numbers=("NCHW", "OIHW", "NCHW"))
        return y + b[None, :, None, None]

    def pool(x):
        return jax.lax.reduce_window(
            x, -jnp.inf, jax.lax.max, (1, 1, 2, 2), (1, 1, 2, 2), "VALID")

    x = jnp.pad(x, ((0, 0), (0, 0), (2, 2), (0, 0)))
    x = conv(x, params["w1"], params["b1"], 2)
    x = jnp.pad(x, ((0, 0), (0, 0), (1, 1), (0, 0)))
    x = jnp.maximum(pool(x), 0.0)
    x = jnp.pad(x, ((0, 0), (0, 0), (2, 2), (0, 1)))
    x = conv(x, params["w2"], params["b2"], 2)
    x = jnp.pad(x, ((0, 0), (0, 0), (1, 1), (0, 0)))
    x = jnp.maximum(pool(x), 0.0)
    x = x.reshape(x.shape[0], -1)
    x = jnp.maximum(x @ params["wf1"] + params["bf1"], 0.0)
    x = jnp.maximum(x @ params["wf2"] + params["bf2"], 0.0)
    return x


if __name__ == "__main__":
    key = jax.random.PRNGKey(0)
    ks = jax.random.split(key, 8)

    N, C, H, W = 2, 3, 32, 32              # small NCHW input
    channel_1, channel_2, hidden, num_out = 16, 32, 1000, 4
    H4, W4, fdim = _flatten_geometry(H, W, channel_2)   # fdim == 128 for 32x32

    x = jax.random.normal(ks[0], (N, C, H, W), jnp.float32)
    params = {
        "w1": jax.random.normal(ks[1], (channel_1, C, 3, 3), jnp.float32) * 0.05,
        "b1": jax.random.normal(ks[2], (channel_1,), jnp.float32) * 0.05,
        "w2": jax.random.normal(ks[3], (channel_2, channel_1, 3, 3), jnp.float32) * 0.05,
        "b2": jax.random.normal(ks[4], (channel_2,), jnp.float32) * 0.05,
        "wf1": jax.random.normal(ks[5], (fdim, hidden), jnp.float32) * 0.05,
        "bf1": jax.random.normal(ks[6], (hidden,), jnp.float32) * 0.05,
        "wf2": jax.random.normal(ks[7], (hidden, num_out), jnp.float32) * 0.05,
        "bf2": jnp.zeros((num_out,), jnp.float32),
    }

    out = jax.jit(reg_classifier1_forward)(x, params)
    out = jax.block_until_ready(out)

    ref = reference_forward(x, params)
    assert out.shape == (N, num_out), out.shape
    err = float(jnp.max(jnp.abs(out - ref)))
    assert jnp.allclose(out, ref, rtol=2e-2, atol=2e-2), err

    print("KERNEL_OK")
</pallas_src>

<mosaic_0001>
module attributes {stable_mosaic.version = 11 : i64} {
  func.func @_conv_pool_relu_kernel(%arg0: i32, %arg1: memref<4x128x27xbf16, #tpu.memory_space<vmem>>, %arg2: memref<27x128xbf16, #tpu.memory_space<vmem>>, %arg3: memref<1x128xf32, #tpu.memory_space<vmem>>, %arg4: memref<128x128xbf16, #tpu.memory_space<vmem>>) attributes {dimension_semantics = [#tpu.dimension_semantics<parallel>], iteration_bounds = array<i64: 1>, scalar_prefetch = 0 : i64, scratch_operands = 0 : i64, tpu.core_type = #tpu.core_type<tc>, window_params = [{transform_indices = @transform_0, window_bounds = array<i64: 4, 128, 27>}, {pipeline_mode = #tpu.pipeline_mode<synchronous>, transform_indices = @transform_1, window_bounds = array<i64: 27, 128>}, {pipeline_mode = #tpu.pipeline_mode<synchronous>, transform_indices = @transform_2, window_bounds = array<i64: 1, 128>}, {transform_indices = @transform_3, window_bounds = array<i64: 128, 128>}]} {
    %c0 = arith.constant 0 : index
    %c0_0 = arith.constant 0 : index
    %0 = vector.load %arg2[%c0, %c0_0] : memref<27x128xbf16, #tpu.memory_space<vmem>>, vector<27x128xbf16>
    %c0_1 = arith.constant 0 : index
    %c0_2 = arith.constant 0 : index
    %c0_3 = arith.constant 0 : index
    %1 = vector.load %arg1[%c0_1, %c0_2, %c0_3] : memref<4x128x27xbf16, #tpu.memory_space<vmem>>, vector<1x128x27xbf16>
    %2 = vector.shape_cast %1 : vector<1x128x27xbf16> to vector<128x27xbf16>
    %cst = arith.constant dense<0.000000e+00> : vector<128x128xf32>
    %3 = tpu.matmul %2, %0, %cst {dimension_numbers = #tpu.dot_dimension_numbers<[1], [0], [0], [1], [0, 0, 1, 1], [], []>} : vector<128x27xbf16>, vector<27x128xbf16>, vector<128x128xf32> -> vector<128x128xf32>
    %c1 = arith.constant 1 : index
    %c0_4 = arith.constant 0 : index
    %c0_5 = arith.constant 0 : index
    %4 = vector.load %arg1[%c1, %c0_4, %c0_5] : memref<4x128x27xbf16, #tpu.memory_space<vmem>>, vector<1x128x27xbf16>
    %5 = vector.shape_cast %4 : vector<1x128x27xbf16> to vector<128x27xbf16>
    %cst_6 = arith.constant dense<0.000000e+00> : vector<128x128xf32>
    %6 = tpu.matmul %5, %0, %cst_6 {dimension_numbers = #tpu.dot_dimension_numbers<[1], [0], [0], [1], [0, 0, 1, 1], [], []>} : vector<128x27xbf16>, vector<27x128xbf16>, vector<128x128xf32> -> vector<128x128xf32>
    %c2 = arith.constant 2 : index
    %c0_7 = arith.constant 0 : index
    %c0_8 = arith.constant 0 : index
    %7 = vector.load %arg1[%c2, %c0_7, %c0_8] : memref<4x128x27xbf16, #tpu.memory_space<vmem>>, vector<1x128x27xbf16>
    %8 = vector.shape_cast %7 : vector<1x128x27xbf16> to vector<128x27xbf16>
    %cst_9 = arith.constant dense<0.000000e+00> : vector<128x128xf32>
    %9 = tpu.matmul %8, %0, %cst_9 {dimension_numbers = #tpu.dot_dimension_numbers<[1], [0], [0], [1], [0, 0, 1, 1], [], []>} : vector<128x27xbf16>, vector<27x128xbf16>, vector<128x128xf32> -> vector<128x128xf32>
    %c3 = arith.constant 3 : index
    %c0_10 = arith.constant 0 : index
    %c0_11 = arith.constant 0 : index
    %10 = vector.load %arg1[%c3, %c0_10, %c0_11] : memref<4x128x27xbf16, #tpu.memory_space<vmem>>, vector<1x128x27xbf16>
    %11 = vector.shape_cast %10 : vector<1x128x27xbf16> to vector<128x27xbf16>
    %cst_12 = arith.constant dense<0.000000e+00> : vector<128x128xf32>
    %12 = tpu.matmul %11, %0, %cst_12 {dimension_numbers = #tpu.dot_dimension_numbers<[1], [0], [0], [1], [0, 0, 1, 1], [], []>} : vector<128x27xbf16>, vector<27x128xbf16>, vector<128x128xf32> -> vector<128x128xf32>
    %13 = arith.maximumf %3, %6 : vector<128x128xf32>
    %14 = arith.maximumf %9, %12 : vector<128x128xf32>
    %15 = arith.maximumf %13, %14 : vector<128x128xf32>
    %c0_13 = arith.constant 0 : index
    %c0_14 = arith.constant 0 : index
    %16 = vector.load %arg3[%c0_13, %c0_14] : memref<1x128xf32, #tpu.memory_space<vmem>>, vector<1x128xf32>
    %17 = vector.broadcast %16 : vector<1x128xf32> to vector<128x128xf32>
    %18 = arith.addf %15, %17 : vector<128x128xf32>
    %cst_15 = arith.constant 0.000000e+00 : f32
    %19 = vector.broadcast %cst_15 : f32 to vector<128x128xf32>
    %20 = arith.maximumf %18, %19 : vector<128x128xf32>
    %21 = arith.truncf %20 : vector<128x128xf32> to vector<128x128xbf16>
    %c0_16 = arith.constant 0 : index
    %c0_17 = arith.constant 0 : index
    %22 = vector.load %arg4[%c0_16, %c0_17] : memref<128x128xbf16, #tpu.memory_space<vmem>>, vector<128x128xbf16>
    tpu.vector_store %arg4[%c0_16, %c0_17], %21 {strides = array<i32>} : memref<128x128xbf16, #tpu.memory_space<vmem>>, vector<128x128xbf16>,
    return
  }
  func.func @transform_0(%arg0: i32) -> (i32, i32, i32) {
    %c0_i32 = arith.constant 0 : i32
    %c0_i32_0 = arith.constant 0 : i32
    %c0_i32_1 = arith.constant 0 : i32
    return %c0_i32, %arg0, %c0_i32_0 : i32, i32, i32
  }
  func.func @transform_1(%arg0: i32) -> (i32, i32) {
    %c0_i32 = arith.constant 0 : i32
    %c0_i32_0 = arith.constant 0 : i32
    %c0_i32_1 = arith.constant 0 : i32
    return %c0_i32, %c0_i32_0 : i32, i32
  }
  func.func @transform_2(%arg0: i32) -> (i32, i32) {
    %c0_i32 = arith.constant 0 : i32
    %c0_i32_0 = arith.constant 0 : i32
    %c0_i32_1 = arith.constant 0 : i32
    return %c0_i32, %c0_i32_0 : i32, i32
  }
  func.func @transform_3(%arg0: i32) -> (i32, i32) {
    %c0_i32 = arith.constant 0 : i32
    %c0_i32_0 = arith.constant 0 : i32
    return %arg0, %c0_i32 : i32, i32
  }
}

module attributes {stable_mosaic.version = 11 : i64} {
  func.func @_conv_pool_relu_kernel(%arg0: i32, %arg1: memref<4x8x1152xbf16, #tpu.memory_space<vmem>>, %arg2: memref<1152x128xbf16, #tpu.memory_space<vmem>>, %arg3: memref<1x128xf32, #tpu.memory_space<vmem>>, %arg4: memref<8x128xbf16, #tpu.memory_space<vmem>>) attributes {dimension_semantics = [#tpu.dimension_semantics<parallel>], iteration_bounds = array<i64: 1>, scalar_prefetch = 0 : i64, scratch_operands = 0 : i64, tpu.core_type = #tpu.core_type<tc>, window_params = [{transform_indices = @transform_0, window_bounds = array<i64: 4, 8, 1152>}, {pipeline_mode = #tpu.pipeline_mode<synchronous>, transform_indices = @transform_1, window_bounds = array<i64: 1152, 128>}, {pipeline_mode = #tpu.pipeline_mode<synchronous>, transform_indices = @transform_2, window_bounds = array<i64: 1, 128>}, {transform_indices = @transform_3, window_bounds = array<i64: 8, 128>}]} {
    %c0 = arith.constant 0 : index
    %c0_0 = arith.constant 0 : index
    %0 = vector.load %arg2[%c0, %c0_0] : memref<1152x128xbf16, #tpu.memory_space<vmem>>, vector<1152x128xbf16>
    %c0_1 = arith.constant 0 : index
    %c0_2 = arith.constant 0 : index
    %c0_3 = arith.constant 0 : index
    %1 = vector.load %arg1[%c0_1, %c0_2, %c0_3] : memref<4x8x1152xbf16, #tpu.memory_space<vmem>>, vector<1x8x1152xbf16>
    %2 = vector.shape_cast %1 : vector<1x8x1152xbf16> to vector<8x1152xbf16>
    %cst = arith.constant dense<0.000000e+00> : vector<8x128xf32>
    %3 = tpu.matmul %2, %0, %cst {dimension_numbers = #tpu.dot_dimension_numbers<[1], [0], [0], [1], [0, 0, 1, 1], [], []>} : vector<8x1152xbf16>, vector<1152x128xbf16>, vector<8x128xf32> -> vector<8x128xf32>
    %c1 = arith.constant 1 : index
    %c0_4 = arith.constant 0 : index
    %c0_5 = arith.constant 0 : index
    %4 = vector.load %arg1[%c1, %c0_4, %c0_5] : memref<4x8x1152xbf16, #tpu.memory_space<vmem>>, vector<1x8x1152xbf16>
    %5 = vector.shape_cast %4 : vector<1x8x1152xbf16> to vector<8x1152xbf16>
    %cst_6 = arith.constant dense<0.000000e+00> : vector<8x128xf32>
    %6 = tpu.matmul %5, %0, %cst_6 {dimension_numbers = #tpu.dot_dimension_numbers<[1], [0], [0], [1], [0, 0, 1, 1], [], []>} : vector<8x1152xbf16>, vector<1152x128xbf16>, vector<8x128xf32> -> vector<8x128xf32>
    %c2 = arith.constant 2 : index
    %c0_7 = arith.constant 0 : index
    %c0_8 = arith.constant 0 : index
    %7 = vector.load %arg1[%c2, %c0_7, %c0_8] : memref<4x8x1152xbf16, #tpu.memory_space<vmem>>, vector<1x8x1152xbf16>
    %8 = vector.shape_cast %7 : vector<1x8x1152xbf16> to vector<8x1152xbf16>
    %cst_9 = arith.constant dense<0.000000e+00> : vector<8x128xf32>
    %9 = tpu.matmul %8, %0, %cst_9 {dimension_numbers = #tpu.dot_dimension_numbers<[1], [0], [0], [1], [0, 0, 1, 1], [], []>} : vector<8x1152xbf16>, vector<1152x128xbf16>, vector<8x128xf32> -> vector<8x128xf32>
    %c3 = arith.constant 3 : index
    %c0_10 = arith.constant 0 : index
    %c0_11 = arith.constant 0 : index
    %10 = vector.load %arg1[%c3, %c0_10, %c0_11] : memref<4x8x1152xbf16, #tpu.memory_space<vmem>>, vector<1x8x1152xbf16>
    %11 = vector.shape_cast %10 : vector<1x8x1152xbf16> to vector<8x1152xbf16>
    %cst_12 = arith.constant dense<0.000000e+00> : vector<8x128xf32>
    %12 = tpu.matmul %11, %0, %cst_12 {dimension_numbers = #tpu.dot_dimension_numbers<[1], [0], [0], [1], [0, 0, 1, 1], [], []>} : vector<8x1152xbf16>, vector<1152x128xbf16>, vector<8x128xf32> -> vector<8x128xf32>
    %13 = arith.maximumf %3, %6 : vector<8x128xf32>
    %14 = arith.maximumf %9, %12 : vector<8x128xf32>
    %15 = arith.maximumf %13, %14 : vector<8x128xf32>
    %c0_13 = arith.constant 0 : index
    %c0_14 = arith.constant 0 : index
    %16 = vector.load %arg3[%c0_13, %c0_14] : memref<1x128xf32, #tpu.memory_space<vmem>>, vector<1x128xf32>
    %17 = vector.broadcast %16 : vector<1x128xf32> to vector<8x128xf32>
    %18 = arith.addf %15, %17 : vector<8x128xf32>
    %cst_15 = arith.constant 0.000000e+00 : f32
    %19 = vector.broadcast %cst_15 : f32 to vector<8x128xf32>
    %20 = arith.maximumf %18, %19 : vector<8x128xf32>
    %21 = arith.truncf %20 : vector<8x128xf32> to vector<8x128xbf16>
    %c0_16 = arith.constant 0 : index
    %c0_17 = arith.constant 0 : index
    %22 = vector.load %arg4[%c0_16, %c0_17] : memref<8x128xbf16, #tpu.memory_space<vmem>>, vector<8x128xbf16>
    tpu.vector_store %arg4[%c0_16, %c0_17], %21 {strides = array<i32>} : memref<8x128xbf16, #tpu.memory_space<vmem>>, vector<8x128xbf16>,
    return
  }
  func.func @transform_0(%arg0: i32) -> (i32, i32, i32) {
    %c0_i32 = arith.constant 0 : i32
    %c0_i32_0 = arith.constant 0 : i32
    %c0_i32_1 = arith.constant 0 : i32
    return %c0_i32, %arg0, %c0_i32_0 : i32, i32, i32
  }
  func.func @transform_1(%arg0: i32) -> (i32, i32) {
    %c0_i32 = arith.constant 0 : i32
    %c0_i32_0 = arith.constant 0 : i32
    %c0_i32_1 = arith.constant 0 : i32
    return %c0_i32, %c0_i32_0 : i32, i32
  }
  func.func @transform_2(%arg0: i32) -> (i32, i32) {
    %c0_i32 = arith.constant 0 : i32
    %c0_i32_0 = arith.constant 0 : i32
    %c0_i32_1 = arith.constant 0 : i32
    return %c0_i32, %c0_i32_0 : i32, i32
  }
  func.func @transform_3(%arg0: i32) -> (i32, i32) {
    %c0_i32 = arith.constant 0 : i32
    %c0_i32_0 = arith.constant 0 : i32
    return %arg0, %c0_i32 : i32, i32
  }
}

module attributes {stable_mosaic.version = 11 : i64} {
  func.func @_fc1_fc2_kernel(%arg0: i32, %arg1: i32, %arg2: i32, %arg3: memref<2x256xbf16, #tpu.memory_space<vmem>>, %arg4: memref<256x1024xbf16, #tpu.memory_space<vmem>>, %arg5: memref<1x1024xf32, #tpu.memory_space<vmem>>, %arg6: memref<1024x128xbf16, #tpu.memory_space<vmem>>, %arg7: memref<1x128xf32, #tpu.memory_space<vmem>>, %arg8: memref<2x128xf32, #tpu.memory_space<vmem>>, %arg9: memref<2x1024xf32, #tpu.memory_space<vmem>>) attributes {dimension_semantics = [#tpu.dimension_semantics<parallel>, #tpu.dimension_semantics<parallel>, #tpu.dimension_semantics<arbitrary>], iteration_bounds = array<i64: 1, 1, 2>, scalar_prefetch = 0 : i64, scratch_operands = 1 : i64, tpu.core_type = #tpu.core_type<tc>, window_params = [{transform_indices = @transform_0, window_bounds = array<i64: 2, 256>}, {transform_indices = @transform_1, window_bounds = array<i64: 256, 1024>}, {transform_indices = @transform_2, window_bounds = array<i64: 1, 1024>}, {pipeline_mode = #tpu.pipeline_mode<synchronous>, transform_indices = @transform_3, window_bounds = array<i64: 1024, 128>}, {pipeline_mode = #tpu.pipeline_mode<synchronous>, transform_indices = @transform_4, window_bounds = array<i64: 1, 128>}, {transform_indices = @transform_5, window_bounds = array<i64: 2, 128>}]} {
    %c0_i32 = arith.constant 0 : i32
    %0 = arith.cmpi eq, %arg2, %c0_i32 : i32
    %1 = arith.extui %0 : i1 to i32
    %c0_i32_0 = arith.constant 0 : i32
    %2 = arith.cmpi ne, %1, %c0_i32_0 : i32
    scf.if %2 {
      %cst_9 = arith.constant 0.000000e+00 : f32
      %12 = vector.broadcast %cst_9 : f32 to vector<2x1024xf32>
      %c0_10 = arith.constant 0 : index
      %c0_11 = arith.constant 0 : index
      %13 = vector.load %arg9[%c0_10, %c0_11] : memref<2x1024xf32, #tpu.memory_space<vmem>>, vector<2x1024xf32>
      tpu.vector_store %arg9[%c0_10, %c0_11], %12 {strides = array<i32>} : memref<2x1024xf32, #tpu.memory_space<vmem>>, vector<2x1024xf32>,
    } else {
    }
    %c0 = arith.constant 0 : index
    %c0_1 = arith.constant 0 : index
    %3 = vector.load %arg9[%c0, %c0_1] : memref<2x1024xf32, #tpu.memory_space<vmem>>, vector<2x1024xf32>
    %c0_2 = arith.constant 0 : index
    %c0_3 = arith.constant 0 : index
    %4 = vector.load %arg3[%c0_2, %c0_3] : memref<2x256xbf16, #tpu.memory_space<vmem>>, vector<2x256xbf16>
    %c0_4 = arith.constant 0 : index
    %c0_5 = arith.constant 0 : index
    %5 = vector.load %arg4[%c0_4, %c0_5] : memref<256x1024xbf16, #tpu.memory_space<vmem>>, vector<256x1024xbf16>
    %cst = arith.constant dense<0.000000e+00> : vector<2x1024xf32>
    %6 = tpu.matmul %4, %5, %cst {dimension_numbers = #tpu.dot_dimension_numbers<[1], [0], [0], [1], [0, 0, 1, 1], [], []>} : vector<2x256xbf16>, vector<256x1024xbf16>, vector<2x1024xf32> -> vector<2x1024xf32>
    %7 = arith.addf %3, %6 : vector<2x1024xf32>
    %c0_6 = arith.constant 0 : index
    %c0_7 = arith.constant 0 : index
    %8 = vector.load %arg9[%c0_6, %c0_7] : memref<2x1024xf32, #tpu.memory_space<vmem>>, vector<2x1024xf32>
    tpu.vector_store %arg9[%c0_6, %c0_7], %7 {strides = array<i32>} : memref<2x1024xf32, #tpu.memory_space<vmem>>, vector<2x1024xf32>,
    %c1_i32 = arith.constant 1 : i32
    %9 = arith.cmpi eq, %arg2, %c1_i32 : i32
    %10 = arith.extui %9 : i1 to i32
    %c0_i32_8 = arith.constant 0 : i32
    %11 = arith.cmpi ne, %10, %c0_i32_8 : i32
    scf.if %11 {
      %c0_9 = arith.constant 0 : index
      %c0_10 = arith.constant 0 : index
      %12 = vector.load %arg9[%c0_9, %c0_10] : memref<2x1024xf32, #tpu.memory_space<vmem>>, vector<2x1024xf32>
      %c0_11 = arith.constant 0 : index
      %c0_12 = arith.constant 0 : index
      %13 = vector.load %arg5[%c0_11, %c0_12] : memref<1x1024xf32, #tpu.memory_space<vmem>>, vector<1x1024xf32>
      %14 = vector.broadcast %13 : vector<1x1024xf32> to vector<2x1024xf32>
      %15 = arith.addf %12, %14 : vector<2x1024xf32>
      %cst_13 = arith.constant 0.000000e+00 : f32
      %16 = vector.broadcast %cst_13 : f32 to vector<2x1024xf32>
      %17 = arith.maximumf %15, %16 : vector<2x1024xf32>
      %18 = arith.truncf %17 : vector<2x1024xf32> to vector<2x1024xbf16>
      %c0_14 = arith.constant 0 : index
      %c0_15 = arith.constant 0 : index
      %19 = vector.load %arg6[%c0_14, %c0_15] : memref<1024x128xbf16, #tpu.memory_space<vmem>>, vector<1024x128xbf16>
      %cst_16 = arith.constant dense<0.000000e+00> : vector<2x128xf32>
      %20 = tpu.matmul %18, %19, %cst_16 {dimension_numbers = #tpu.dot_dimension_numbers<[1], [0], [0], [1], [0, 0, 1, 1], [], []>} : vector<2x1024xbf16>, vector<1024x128xbf16>, vector<2x128xf32> -> vector<2x128xf32>
      %c0_17 = arith.constant 0 : index
      %c0_18 = arith.constant 0 : index
      %21 = vector.load %arg7[%c0_17, %c0_18] : memref<1x128xf32, #tpu.memory_space<vmem>>, vector<1x128xf32>
      %22 = vector.broadcast %21 : vector<1x128xf32> to vector<2x128xf32>
      %23 = arith.addf %20, %22 : vector<2x128xf32>
      %cst_19 = arith.constant 0.000000e+00 : f32
      %24 = vector.broadcast %cst_19 : f32 to vector<2x128xf32>
      %25 = arith.maximumf %23, %24 : vector<2x128xf32>
      %c0_20 = arith.constant 0 : index
      %c0_21 = arith.constant 0 : index
      %26 = vector.load %arg8[%c0_20, %c0_21] : memref<2x128xf32, #tpu.memory_space<vmem>>, vector<2x128xf32>
      tpu.vector_store %arg8[%c0_20, %c0_21], %25 {strides = array<i32>} : memref<2x128xf32, #tpu.memory_space<vmem>>, vector<2x128xf32>,
    } else {
    }
    return
  }
  func.func @transform_0(%arg0: i32, %arg1: i32, %arg2: i32) -> (i32, i32) {
    %c0_i32 = arith.constant 0 : i32
    return %arg0, %arg2 : i32, i32
  }
  func.func @transform_1(%arg0: i32, %arg1: i32, %arg2: i32) -> (i32, i32) {
    %c0_i32 = arith.constant 0 : i32
    return %arg2, %arg1 : i32, i32
  }
  func.func @transform_2(%arg0: i32, %arg1: i32, %arg2: i32) -> (i32, i32) {
    %c0_i32 = arith.constant 0 : i32
    %c0_i32_0 = arith.constant 0 : i32
    return %c0_i32, %arg1 : i32, i32
  }
  func.func @transform_3(%arg0: i32, %arg1: i32, %arg2: i32) -> (i32, i32) {
    %c0_i32 = arith.constant 0 : i32
    %c0_i32_0 = arith.constant 0 : i32
    %c0_i32_1 = arith.constant 0 : i32
    return %c0_i32, %c0_i32_0 : i32, i32
  }
  func.func @transform_4(%arg0: i32, %arg1: i32, %arg2: i32) -> (i32, i32) {
    %c0_i32 = arith.constant 0 : i32
    %c0_i32_0 = arith.constant 0 : i32
    %c0_i32_1 = arith.constant 0 : i32
    return %c0_i32, %c0_i32_0 : i32, i32
  }
  func.func @transform_5(%arg0: i32, %arg1: i32, %arg2: i32) -> (i32, i32) {
    %c0_i32 = arith.constant 0 : i32
    %c0_i32_0 = arith.constant 0 : i32
    return %arg0, %c0_i32 : i32, i32
  }
}

</mosaic_0001>

<bundles_post_ra>
// kernel: reg_classifier1_forward.3
= control target key start
LH: loop header
LB: loop body
LE: loop exit
PB: predicated region body
PF: predicated region fallthrough
CT: control target
= control target key end

     0   :  { %vm111_vm0 = vcmask 1044480   ;;  %vm112_vm1 = vcmask 1045504   ;;  %v1269_v1 = vmov 65535   ;;  %vm86_vm2 = vcmask 220160   ;;  %s1535_s1 = inlined_call_operand.vmem [shape: bf16[27,128], index: 1, kind: input, shape index: {}]   ;;  %s1536_s0 = inlined_call_operand.vmem [shape: bf16[4,128,27], index: 0, kind: input, shape index: {}]   ;;  %s1537_s2 = inlined_call_operand.vmem [shape: f32[1,128], index: 2, kind: input, shape index: {}]   ;;  %s1538_s3 = inlined_call_operand.vmem [shape: bf16[128,128], index: 3, kind: output, shape index: {}]  }
   0x1   :  { %v1235_v0 = vld [vmem:[%s1535_s1 + $0x8] sm:$0x3f]   ;;  %v113_v2 = vsel %vm111_vm0, 4294967295, %v1269_v1  ;;  %v1237_v4 = vld [vmem:[%s1536_s0] sm:$0xff]   ;;  %v1241_v10 = vld [vmem:[%s1536_s0 + $0x10] sm:$0xff]  }
   0x2   :  { %v114_v3 = vsel %vm112_vm1, %v113_v2, 0  ;;  %v1236_v6 = vld [vmem:[%s1535_s1] sm:$0xff]   ;;  %1158 = vmatprep.mubr.msk.bf16.mxu0 %vm86_vm2, %v1237_v4  ;;  %v1239_v8 = vld [vmem:[%s1536_s0 + $0x8] sm:$0xff]   ;;  %v1242_v11 = vld [vmem:[%s1536_s0 + $0x50] sm:$0xff]  }
   0x3   :  { %v116_v5 = vand.u32 %v1235_v0, %v114_v3  ;;  %v1238_v7 = vld [vmem:[%s1536_s0 + $0x40] sm:$0xff]   ;;  %v1240_v9 = vld [vmem:[%s1536_s0 + $0x48] sm:$0xff]   ;;  %v1243_v12 = vld [vmem:[%s1536_s0 + $0x18] sm:$0xff]  }
   0x4   :  { %1178 = vmatprep.mubr.msk.bf16.mxu1 %vm86_vm2, %v1238_v7  ;;  %v1244_v13 = vld [vmem:[%s1536_s0 + $0x58] sm:$0xff]   ;;  %v1245_v14 = vld [vmem:[%s1536_s0 + $0x20] sm:$0xff]   ;;  %v1247_v16 = vld [vmem:[%s1536_s0 + $0x28] sm:$0xff]  }
   0x5   :  { %1154 = vmatprep.subr.bf16.mxu0 %v116_v5  ;;  %1174 = vmatprep.subr.bf16.mxu1 %v116_v5  ;;  %v1246_v15 = vld [vmem:[%s1536_s0 + $0x60] sm:$0xff]   ;;  %v1248_v17 = vld [vmem:[%s1536_s0 + $0x68] sm:$0xff]   ;;  %v1249_v18 = vld [vmem:[%s1536_s0 + $0x30] sm:$0xff]  }
   0x6   :  { %1155 = vmatpush3.bf16.msra.mxu0 %v116_v5  ;;  %1175 = vmatpush3.bf16.msra.mxu1 %v116_v5  ;;  %v1250_v19 = vld [vmem:[%s1536_s0 + $0x70] sm:$0xff]   ;;  %v1251_v20 = vld [vmem:[%s1536_s0 + $0x38] sm:$0xff]   ;;  %v1253_v22 = vld [vmem:[%s1536_s0 + $0x80] sm:$0xff]  }
   0x7   :  { %1156 = vmatprep.subr.bf16.mxu0 %v1236_v6  ;;  %1176 = vmatprep.subr.bf16.mxu1 %v1236_v6  ;;  %v1252_v21 = vld [vmem:[%s1536_s0 + $0x78] sm:$0xff]   ;;  %v1254_v23 = vld [vmem:[%s1536_s0 + $0xc0] sm:$0xff]   ;;  %v1255_v24 = vld [vmem:[%s1536_s0 + $0x88] sm:$0xff]  }
   0x8   :  { %v1256_v25 = vld [vmem:[%s1536_s0 + $0xc8] sm:$0xff]   ;;  %v1257_v26 = vld [vmem:[%s1536_s0 + $0x90] sm:$0xff]   ;;  %v1259_v28 = vld [vmem:[%s1536_s0 + $0x98] sm:$0xff]  }
   0x9   :  { %v1258_v27 = vld [vmem:[%s1536_s0 + $0xd0] sm:$0xff]   ;;  %v1260_v29 = vld [vmem:[%s1536_s0 + $0xd8] sm:$0xff]   ;;  %v1261_v30 = vld [vmem:[%s1536_s0 + $0xa0] sm:$0xff]  }
   0xa   :  { %1157 = vmatpush3.bf16.msra.mxu0 %v1236_v6  ;;  %1177 = vmatpush3.bf16.msra.mxu1 %v1236_v6  ;;  %v1262_v31 = vld [vmem:[%s1536_s0 + $0xe0] sm:$0xff]   ;;  %v1263_v32 = vld [vmem:[%s1536_s0 + $0xa8] sm:$0xff]   ;;  %v1265_v34 = vld [vmem:[%s1536_s0 + $0xb0] sm:$0xff]  }
   0xb   :  { %1194 = vmatprep.subr.bf16.mxu0 %v116_v5  ;;  %1214 = vmatprep.subr.bf16.mxu1 %v116_v5  ;;  %v1264_v33 = vld [vmem:[%s1536_s0 + $0xe8] sm:$0xff]   ;;  %v1266_v35 = vld [vmem:[%s1536_s0 + $0xf0] sm:$0xff]   ;;  %v1267_v36 = vld [vmem:[%s1536_s0 + $0xb8] sm:$0xff]  }
   0xc   :  { %v1268_v37 = vld [vmem:[%s1536_s0 + $0xf8] sm:$0xff]  }
   0xd   :  { %1159 = vmatmul.mubr.msk.bf16.vlgmr.msra.gmra.mxu0 %vm86_vm2, %v1239_v8  ;;  %1179 = vmatmul.mubr.msk.bf16.vlgmr.msra.gmra.mxu1 %vm86_vm2, %v1240_v9 }
   0xe   :  { %1195 = vmatpush3.bf16.msra.mxu0 %v116_v5  ;;  %1215 = vmatpush3.bf16.msra.mxu1 %v116_v5 }
   0xf   :  { %1162 = vmatprep.mubr.msk.bf16.mxu0 %vm86_vm2, %v1241_v10  ;;  %1182 = vmatprep.mubr.msk.bf16.mxu1 %vm86_vm2, %v1242_v11 }
  0x10   :  { %1196 = vmatprep.subr.bf16.mxu0 %v1236_v6  ;;  %1216 = vmatprep.subr.bf16.mxu1 %v1236_v6 }
  0x12   :  { %1197 = vmatpush3.bf16.msra.mxu0 %v1236_v6  ;;  %1217 = vmatpush3.bf16.msra.mxu1 %v1236_v6 }
  0x15   :  { %1163 = vmatmul.mubr.msk.bf16.gmra.mxu0 %vm86_vm2, %v1243_v12  ;;  %1183 = vmatmul.mubr.msk.bf16.gmra.mxu1 %vm86_vm2, %v1244_v13 }
  0x16   :  { %1166 = vmatprep.mubr.msk.bf16.mxu0 %vm86_vm2, %v1245_v14  ;;  %1186 = vmatprep.mubr.msk.bf16.mxu1 %vm86_vm2, %v1246_v15  ;;  %v1471_v15 = vld [vmem:[%s1537_s2] ss:$0 sm:$0xff] }
  0x1d   :  { %1167 = vmatmul.mubr.msk.bf16.gmra.mxu0 %vm86_vm2, %v1247_v16  ;;  %1187 = vmatmul.mubr.msk.bf16.gmra.mxu1 %vm86_vm2, %v1248_v17 }
  0x1e   :  { %1170 = vmatprep.mubr.msk.bf16.mxu0 %vm86_vm2, %v1249_v18  ;;  %1190 = vmatprep.mubr.msk.bf16.mxu1 %vm86_vm2, %v1250_v19 }
  0x25   :  { %1171 = vmatmul.mubr.msk.bf16.gmra.mxu0 %vm86_vm2, %v1251_v20  ;;  %1191 = vmatmul.mubr.msk.bf16.gmra.mxu1 %vm86_vm2, %v1252_v21 }
  0x26   :  { %1198 = vmatprep.mubr.msk.bf16.mxu0 %vm86_vm2, %v1253_v22  ;;  %1218 = vmatprep.mubr.msk.bf16.mxu1 %vm86_vm2, %v1254_v23 }
  0x2d   :  { %1199 = vmatmul.mubr.msk.bf16.vlgmr.msra.gmra.mxu0 %vm86_vm2, %v1255_v24  ;;  %1219 = vmatmul.mubr.msk.bf16.vlgmr.msra.gmra.mxu1 %vm86_vm2, %v1256_v25 }
  0x2e   :  { %1202 = vmatprep.mubr.msk.bf16.mxu0 %vm86_vm2, %v1257_v26  ;;  %1222 = vmatprep.mubr.msk.bf16.mxu1 %vm86_vm2, %v1258_v27 }
  0x35   :  { %1203 = vmatmul.mubr.msk.bf16.gmra.mxu0 %vm86_vm2, %v1259_v28  ;;  %1223 = vmatmul.mubr.msk.bf16.gmra.mxu1 %vm86_vm2, %v1260_v29 }
  0x36   :  { %1206 = vmatprep.mubr.msk.bf16.mxu0 %vm86_vm2, %v1261_v30  ;;  %1226 = vmatprep.mubr.msk.bf16.mxu1 %vm86_vm2, %v1262_v31 }
  0x3d   :  { %1207 = vmatmul.mubr.msk.bf16.gmra.mxu0 %vm86_vm2, %v1263_v32  ;;  %1227 = vmatmul.mubr.msk.bf16.gmra.mxu1 %vm86_vm2, %v1264_v33 }
  0x3e   :  { %1210 = vmatprep.mubr.msk.bf16.mxu0 %vm86_vm2, %v1265_v34  ;;  %1230 = vmatprep.mubr.msk.bf16.mxu1 %vm86_vm2, %v1266_v35 }
  0x45   :  { %1211 = vmatmul.mubr.msk.bf16.gmra.mxu0 %vm86_vm2, %v1267_v36  ;;  %1231 = vmatmul.mubr.msk.bf16.gmra.mxu1 %vm86_vm2, %v1268_v37 }
  0xcd   :  { %v1160_v38 = vpop.f32.mrf.mxu0  ;;  %v1180_v39 = vpop.f32.mrf.mxu1 }
  0xce   :  { %v751_v8 = vmax.f32 %v1160_v38, %v1180_v39 }
  0xcf   :  { %v152_v40 = vpop.f32.mrf.mxu0  ;;  %v330_v41 = vpop.f32.mrf.mxu1 }
  0xd0   :  { %v749_v12 = vmax.f32 %v152_v40, %v330_v41 }
  0xd1   :  { %v1161_v42 = vpop.f32.mrf.mxu0  ;;  %v1181_v43 = vpop.f32.mrf.mxu1 }
  0xd2   :  { %v752_v18 = vmax.f32 %v1161_v42, %v1181_v43 }
  0xd3   :  { %v155_v44 = vpop.f32.mrf.mxu0  ;;  %v333_v45 = vpop.f32.mrf.mxu1 }
  0xd4   :  { %v750_v23 = vmax.f32 %v155_v44, %v333_v45 }
  0xd5   :  { %v1164_v46 = vpop.f32.mrf.mxu0  ;;  %v1184_v47 = vpop.f32.mrf.mxu1 }
  0xd6   :  { %v755_v33 = vmax.f32 %v1164_v46, %v1184_v47 }
  0xd7   :  { %v1424_v48 = vpop.f32.mrf.mxu0  ;;  %v1426_v49 = vpop.f32.mrf.mxu1 }
  0xd8   :  { %v753_v34 = vmax.f32 %v1424_v48, %v1426_v49 }
  0xd9   :  { %v1428_v50 = vpop.f32.mrf.mxu0  ;;  %v1430_v51 = vpop.f32.mrf.mxu1 }
  0xda   :  { %v756_v46 = vmax.f32 %v1428_v50, %v1430_v51 }
  0xdb   :  { %v1432_v52 = vpop.f32.mrf.mxu0  ;;  %v1434_v53 = vpop.f32.mrf.mxu1 }
  0xdc   :  { %v754_v49 = vmax.f32 %v1432_v52, %v1434_v53 }
  0xdd   :  { %v1436_v54 = vpop.f32.mrf.mxu0  ;;  %v1438_v55 = vpop.f32.mrf.mxu1 }
  0xde   :  { %v759_v50 = vmax.f32 %v1436_v54, %v1438_v55 }
  0xdf   :  { %v1440_v56 = vpop.f32.mrf.mxu0  ;;  %v1442_v57 = vpop.f32.mrf.mxu1 }
  0xe1   :  { %v1444_v58 = vpop.f32.mrf.mxu0  ;;  %v1446_v59 = vpop.f32.mrf.mxu1 }
  0xe3   :  { %v1448_v60 = vpop.f32.mrf.mxu0  ;;  %v1450_v61 = vpop.f32.mrf.mxu1 }
  0xe5   :  { %v1452_v62 = vpop.f32.mrf.mxu0  ;;  %v1454_v63 = vpop.f32.mrf.mxu1 }
  0xe7   :  { %v1456_v0 = vpop.f32.mrf.mxu0  ;;  %v1458_v1 = vpop.f32.mrf.mxu1 }
  0xe9   :  { %v1460_v2 = vpop.f32.mrf.mxu0  ;;  %v1462_v3 = vpop.f32.mrf.mxu1 }
  0xeb   :  { %v1464_v4 = vpop.f32.mrf.mxu0  ;;  %v1466_v5 = vpop.f32.mrf.mxu1 }
  0xed   :  { %v1200_v6 = vpop.f32.mrf.mxu0  ;;  %v1220_v7 = vpop.f32.mrf.mxu1 }
  0xee   :  { %v767_v9 = vmax.f32 %v1200_v6, %v1220_v7 }
  0xef   :  { %v508_v10 = vpop.f32.mrf.mxu0  ;;  %v686_v11 = vpop.f32.mrf.mxu1 }
  0xf0   :  { %v783_v13 = vmax.f32 %v751_v8, %v767_v9  ;;  %v765_v14 = vmax.f32 %v508_v10, %v686_v11 }
  0xf1   :  { %v1201_v16 = vpop.f32.mrf.mxu0  ;;  %v1221_v17 = vpop.f32.mrf.mxu1 }
  0xf2   :  { %v781_v19 = vmax.f32 %v749_v12, %v765_v14  ;;  %v768_v20 = vmax.f32 %v1201_v16, %v1221_v17  ;;  %v806_v24 = vadd.f32 %v1471_v15, %v783_v13 }
  0xf3   :  { %v511_v21 = vpop.f32.mrf.mxu0  ;;  %v689_v22 = vpop.f32.mrf.mxu1 }
  0xf4   :  { %v784_v25 = vmax.f32 %v752_v18, %v768_v20  ;;  %v766_v26 = vmax.f32 %v511_v21, %v689_v22  ;;  %v804_v29 = vadd.f32 %v1471_v15, %v781_v19  ;;  %v822_v37 = vmax.f32 %v806_v24, 0.0 }
  0xf5   :  { %v1204_v27 = vpop.f32.mrf.mxu0  ;;  %v1224_v28 = vpop.f32.mrf.mxu1  ;;  %v757_v22 = vmax.f32 %v1440_v56, %v1442_v57  ;;  %v758_v56 = vmax.f32 %v1448_v60, %v1450_v61  ;;  %v761_v60 = vmax.f32 %v1456_v0, %v1458_v1 }
  0xf6   :  { %v807_v30 = vadd.f32 %v1471_v15, %v784_v25  ;;  %v782_v31 = vmax.f32 %v750_v23, %v766_v26  ;;  %v771_v32 = vmax.f32 %v1204_v27, %v1224_v28  ;;  %v820_v44 = vmax.f32 %v804_v29, 0.0 }
  0xf7   :  { %v524_v35 = vpop.f32.mrf.mxu0  ;;  %v702_v36 = vpop.f32.mrf.mxu1  ;;  %v760_v25 = vmax.f32 %v1444_v58, %v1446_v59 }
  0xf8   :  { %v823_v38 = vmax.f32 %v807_v30, 0.0  ;;  %v805_v39 = vadd.f32 %v1471_v15, %v782_v31  ;;  %v769_v40 = vmax.f32 %v524_v35, %v702_v36  ;;  %v787_v41 = vmax.f32 %v755_v33, %v771_v32 }
  0xf9   :  { %v1205_v42 = vpop.f32.mrf.mxu0  ;;  %v1225_v43 = vpop.f32.mrf.mxu1  ;;  %v763_v36 = vmax.f32 %v1452_v62, %v1454_v63 }
  0xfa   :  { %v1075_v45 = vpack.c.bf16 %v823_v38, %v822_v37  ;;  %v821_v6 = vmax.f32 %v805_v39, 0.0  ;;  %v785_v7 = vmax.f32 %v753_v34, %v769_v40  ;;  %v772_v47 = vmax.f32 %v1205_v42, %v1225_v43 }
  0xfb   :  { %v527_v8 = vpop.f32.mrf.mxu0  ;;  %v705_v48 = vpop.f32.mrf.mxu1  ;;  %v810_v11 = vadd.f32 %v1471_v15, %v787_v41 }
  0xfc   :  { %1107 = vst [vmem:[%s1538_s3 + $0x8] sm:$0xff] %v1075_v45   ;;  %v1070_v9 = vpack.c.bf16 %v821_v6, %v820_v44  ;;  %v770_v10 = vmax.f32 %v527_v8, %v705_v48  ;;  %v788_v12 = vmax.f32 %v756_v46, %v772_v47  ;;  %v808_v51 = vadd.f32 %v1471_v15, %v785_v7 }
  0xfd   :  { %v1208_v13 = vpop.f32.mrf.mxu0  ;;  %v1228_v14 = vpop.f32.mrf.mxu1  ;;  %v826_v54 = vmax.f32 %v810_v11, 0.0  ;;  %v764_v7 = vmax.f32 %v1460_v2, %v1462_v3 }
  0xfe   :  { %1071 = vst [vmem:[%s1538_s3] sm:$0xff] %v1070_v9   ;;  %v786_v52 = vmax.f32 %v754_v49, %v770_v10  ;;  %v775_v53 = vmax.f32 %v1208_v13, %v1228_v14  ;;  %v811_v16 = vadd.f32 %v1471_v15, %v788_v12  ;;  %v824_v26 = vmax.f32 %v808_v51, 0.0 }
  0xff   :  { %v540_v17 = vpop.f32.mrf.mxu0  ;;  %v718_v18 = vpop.f32.mrf.mxu1  ;;  %v762_v9 = vmax.f32 %v1464_v4, %v1466_v5 }
 0x100   :  { %v809_v19 = vadd.f32 %v1471_v15, %v786_v52  ;;  %v791_v20 = vmax.f32 %v759_v50, %v775_v53  ;;  %v773_v21 = vmax.f32 %v540_v17, %v718_v18  ;;  %v827_v55 = vmax.f32 %v811_v16, 0.0 }
 0x101   :  { %v1209_v23 = vpop.f32.mrf.mxu0  ;;  %v1229_v24 = vpop.f32.mrf.mxu1 }
 0x102   :  { %v825_v27 = vmax.f32 %v809_v19, 0.0  ;;  %v776_v28 = vmax.f32 %v1209_v23, %v1229_v24  ;;  %v1085_v29 = vpack.c.bf16 %v827_v55, %v826_v54  ;;  %v789_v30 = vmax.f32 %v757_v22, %v773_v21 }
 0x103   :  { %v543_v31 = vpop.f32.mrf.mxu0  ;;  %v721_v32 = vpop.f32.mrf.mxu1  ;;  %v814_v34 = vadd.f32 %v1471_v15, %v791_v20 }
 0x104   :  { %v1080_v33 = vpack.c.bf16 %v825_v27, %v824_v26  ;;  %v792_v35 = vmax.f32 %v760_v25, %v776_v28  ;;  %1109 = vst [vmem:[%s1538_s3 + $0x18] sm:$0xff] %v1085_v29   ;;  %v774_v57 = vmax.f32 %v543_v31, %v721_v32  ;;  %v812_v61 = vadd.f32 %v1471_v15, %v789_v30 }
 0x105   :  { %v1212_v58 = vpop.f32.mrf.mxu0  ;;  %v1232_v59 = vpop.f32.mrf.mxu1  ;;  %v830_v42 = vmax.f32 %v814_v34, 0.0 }
 0x106   :  { %1108 = vst [vmem:[%s1538_s3 + $0x10] sm:$0xff] %v1080_v33   ;;  %v815_v37 = vadd.f32 %v1471_v15, %v792_v35  ;;  %v779_v38 = vmax.f32 %v1212_v58, %v1232_v59  ;;  %v790_v39 = vmax.f32 %v758_v56, %v774_v57  ;;  %v828_v0 = vmax.f32 %v812_v61, 0.0 }
 0x107   :  { %v556_v40 = vpop.f32.mrf.mxu0  ;;  %v734_v41 = vpop.f32.mrf.mxu1 }
 0x108   :  { %v831_v43 = vmax.f32 %v815_v37, 0.0  ;;  %v795_v44 = vmax.f32 %v763_v36, %v779_v38  ;;  %v777_v45 = vmax.f32 %v556_v40, %v734_v41  ;;  %v813_v62 = vadd.f32 %v1471_v15, %v790_v39 }
 0x109   :  { %v1213_v63 = vpop.f32.mrf.mxu0  ;;  %v1233_v6 = vpop.f32.mrf.mxu1 }
 0x10a   :  { %v1095_v46 = vpack.c.bf16 %v831_v43, %v830_v42  ;;  %v793_v47 = vmax.f32 %v761_v60, %v777_v45  ;;  %v780_v8 = vmax.f32 %v1213_v63, %v1233_v6  ;;  %v829_v1 = vmax.f32 %v813_v62, 0.0 }
 0x10b   :  { %v559_v48 = vpop.f32.mrf.mxu0  ;;  %v737_v49 = vpop.f32.mrf.mxu1  ;;  %v818_v10 = vadd.f32 %v1471_v15, %v795_v44 }
 0x10c   :  { %1111 = vst [vmem:[%s1538_s3 + $0x28] sm:$0xff] %v1095_v46   ;;  %v796_v11 = vmax.f32 %v764_v7, %v780_v8  ;;  %v778_v12 = vmax.f32 %v559_v48, %v737_v49  ;;  %v1090_v13 = vpack.c.bf16 %v829_v1, %v828_v0  ;;  %v816_v2 = vadd.f32 %v1471_v15, %v793_v47 }
 0x10d   :  { %v834_v50 = vmax.f32 %v818_v10, 0.0 }
 0x10e   :  { %v819_v3 = vadd.f32 %v1471_v15, %v796_v11  ;;  %v794_v14 = vmax.f32 %v762_v9, %v778_v12  ;;  %1110 = vst [vmem:[%s1538_s3 + $0x20] sm:$0xff] %v1090_v13   ;;  %v832_v51 = vmax.f32 %v816_v2, 0.0 }
 0x110   :  { %v835_v4 = vmax.f32 %v819_v3, 0.0  ;;  %v817_v5 = vadd.f32 %v1471_v15, %v794_v14 }
 0x112   :  { %v1105_v52 = vpack.c.bf16 %v835_v4, %v834_v50  ;;  %v833_v53 = vmax.f32 %v817_v5, 0.0 }
 0x114   :  { %1113 = vst [vmem:[%s1538_s3 + $0x38] sm:$0xff] %v1105_v52   ;;  %v1100_v16 = vpack.c.bf16 %v833_v53, %v832_v51 }
 0x116   :  { %1112 = vst [vmem:[%s1538_s3 + $0x30] sm:$0xff] %v1100_v16  }

// kernel: reg_classifier1_forward.4
= control target key start
LH: loop header
LB: loop body
LE: loop exit
PB: predicated region body
PF: predicated region fallthrough
CT: control target
= control target key end

     0   :  { %vm2274_vm0 = vmmov 0   ;;  %s3092_s1 = inlined_call_operand.vmem [shape: bf16[1152,128], index: 1, kind: input, shape index: {}]   ;;  %s3093_s0 = inlined_call_operand.vmem [shape: bf16[4,8,1152], index: 0, kind: input, shape index: {}]   ;;  %s3094_s2 = inlined_call_operand.vmem [shape: f32[1,128], index: 2, kind: input, shape index: {}]   ;;  %s3095_s3 = inlined_call_operand.vmem [shape: bf16[8,128], index: 3, kind: output, shape index: {}]  }
   0x1   :  { %v2298_v0 = vld [vmem:[%s3092_s1 + $0x78] sm:$0xff]   ;;  %v2321_v4 = vld [vmem:[%s3092_s1 + $0x70] sm:$0xff]   ;;  %v2345_v8 = vld [vmem:[%s3092_s1 + $0x68] sm:$0xff]  }
   0x2   :  { %v2303_v1 = vld [vmem:[%s3092_s1 + $0xf8] sm:$0xff]   ;;  %1684 = vmatprep.subr.bf16.mxu0 %v2298_v0  ;;  %v2327_v5 = vld [vmem:[%s3092_s1 + $0xf0] sm:$0xff]   ;;  %v2351_v9 = vld [vmem:[%s3092_s1 + $0xe8] sm:$0xff]  }
   0x3   :  { %v2309_v2 = vld [vmem:[%s3092_s1 + $0x38] sm:$0xff]   ;;  %1706 = vmatprep.subr.bf16.mxu1 %v2303_v1  ;;  %v2333_v6 = vld [vmem:[%s3092_s1 + $0x30] sm:$0xff]   ;;  %v2357_v10 = vld [vmem:[%s3092_s1 + $0x28] sm:$0xff]  }
   0x4   :  { %v2315_v3 = vld [vmem:[%s3092_s1 + $0xb8] sm:$0xff]   ;;  %1685 = vmatpush3.bf16.msra.mxu0 %v2309_v2  ;;  %v2339_v7 = vld [vmem:[%s3092_s1 + $0xb0] sm:$0xff]   ;;  %v2363_v11 = vld [vmem:[%s3092_s1 + $0xa8] sm:$0xff]  }
   0x5   :  { %1707 = vmatpush3.bf16.msra.mxu1 %v2315_v3  ;;  %1686 = vmatprep.subr.bf16.mxu0 %v2321_v4  ;;  %v2369_v12 = vld [vmem:[%s3092_s1 + $0x60] sm:$0xff]   ;;  %v2393_v16 = vld [vmem:[%s3092_s1 + $0x58] sm:$0xff]   ;;  %v2417_v20 = vld [vmem:[%s3092_s1 + $0x50] sm:$0xff]  }
   0x6   :  { %1708 = vmatprep.subr.bf16.mxu1 %v2327_v5  ;;  %v2375_v13 = vld [vmem:[%s3092_s1 + $0xe0] sm:$0xff]   ;;  %3148 = vst [vmem:[#allocation2_spill] sm:$0xff] %v2393_v16  ;;  %v2399_v17 = vld [vmem:[%s3092_s1 + $0xd8] sm:$0xff]   ;;  %3150 = vst [vmem:[#allocation4_spill] sm:$0xff] %v2417_v20 }
   0x7   :  { %v2381_v14 = vld [vmem:[%s3092_s1 + $0x20] sm:$0xff]   ;;  %v2405_v18 = vld [vmem:[%s3092_s1 + $0x18] sm:$0xff]   ;;  %v2423_v21 = vld [vmem:[%s3092_s1 + $0xd0] sm:$0xff]  }
   0x8   :  { %1687 = vmatpush3.bf16.msra.mxu0 %v2333_v6  ;;  %v2387_v15 = vld [vmem:[%s3092_s1 + $0xa0] sm:$0xff]   ;;  %3149 = vst [vmem:[#allocation3_spill] sm:$0xff] %v2405_v18  ;;  %v2411_v19 = vld [vmem:[%s3092_s1 + $0x98] sm:$0xff]   ;;  %v2429_v22 = vld [vmem:[%s3092_s1 + $0x10] sm:$0xff]  }
   0x9   :  { %1709 = vmatpush3.bf16.msra.mxu1 %v2339_v7  ;;  %1688 = vmatprep.subr.bf16.mxu0 %v2345_v8  ;;  %3151 = vst [vmem:[#allocation5_spill] sm:$0xff] %v2429_v22  ;;  %v2435_v23 = vld [vmem:[%s3092_s1 + $0x90] sm:$0xff]   ;;  %v2441_v24 = vld [vmem:[%s3092_s1 + $0x48] sm:$0xff]   ;;  %v2465_v28 = vld [vmem:[%s3092_s1 + $0x40] sm:$0xff]  }
   0xa   :  { %1710 = vmatprep.subr.bf16.mxu1 %v2351_v9  ;;  %3152 = vst [vmem:[#allocation6_spill] sm:$0xff] %v2441_v24  ;;  %v2447_v25 = vld [vmem:[%s3092_s1 + $0xc8] sm:$0xff]   ;;  %3154 = vst [vmem:[#allocation8_spill] sm:$0xff] %v2465_v28  ;;  %v2471_v29 = vld [vmem:[%s3092_s1 + $0xc0] sm:$0xff]  }
   0xb   :  { %v2453_v26 = vld [vmem:[%s3092_s1 + $0x8] sm:$0xff]   ;;  %v2477_v30 = vld [vmem:[%s3092_s1] sm:$0xff]   ;;  %v2496_v38 = vld [vmem:[%s3092_s1 + $0x178] sm:$0xff]  }
   0xc   :  { %1689 = vmatpush3.bf16.msra.mxu0 %v2357_v10  ;;  %3153 = vst [vmem:[#allocation7_spill] sm:$0xff] %v2453_v26  ;;  %v2459_v27 = vld [vmem:[%s3092_s1 + $0x88] sm:$0xff]   ;;  %v2483_v31 = vld [vmem:[%s3092_s1 + $0x80] sm:$0xff]   ;;  %v2501_v39 = vld [vmem:[%s3092_s1 + $0x1f8] sm:$0xff]  }
   0xd   :  { %1711 = vmatpush3.bf16.msra.mxu1 %v2363_v11  ;;  %1690 = vmatprep.subr.bf16.mxu0 %v2369_v12  ;;  %v159_v32 = vld [vmem:[%s3093_s0] sm:$0xff]  ;;  %v160_v33 = vld [vmem:[%s3093_s0 + $0x8] sm:$0xff]  ;;  %v2506_v40 = vld [vmem:[%s3092_s1 + $0x138] sm:$0xff]  }
   0xe   :  { %1712 = vmatprep.subr.bf16.mxu1 %v2375_v13  ;;  %v1560_v34 = vcombine.low %v159_v32, %v159_v32  ;;  %v1561_v35 = vcombine.high %v159_v32, %v159_v32  ;;  %v1562_v36 = vcombine.low %v160_v33, %v160_v33  ;;  %v1563_v37 = vcombine.high %v160_v33, %v160_v33  ;;  %v2511_v41 = vld [vmem:[%s3092_s1 + $0x1b8] sm:$0xff]   ;;  %v2518_v42 = vld [vmem:[%s3092_s1 + $0x170] sm:$0xff]   ;;  %v2542_v46 = vld [vmem:[%s3092_s1 + $0x168] sm:$0xff]  }
   0xf   :  { %v2525_v43 = vld [vmem:[%s3092_s1 + $0x1f0] sm:$0xff]   ;;  %v2549_v47 = vld [vmem:[%s3092_s1 + $0x1e8] sm:$0xff]   ;;  %v2566_v50 = vld [vmem:[%s3092_s1 + $0x160] sm:$0xff]  }
  0x10   :  { %1691 = vmatpush3.bf16.msra.mxu0 %v2381_v14  ;;  %660 = vmatprep.mubr.bf16.mxu0 %v1561_v35  ;;  %v2531_v44 = vld [vmem:[%s3092_s1 + $0x130] sm:$0xff]   ;;  %v2555_v48 = vld [vmem:[%s3092_s1 + $0x128] sm:$0xff]   ;;  %v2573_v51 = vld [vmem:[%s3092_s1 + $0x1e0] sm:$0xff]  }
  0x11   :  { %1713 = vmatpush3.bf16.msra.mxu1 %v2387_v15  ;;  %1692 = vmatprep.subr.bf16.mxu0 %v2393_v16  ;;  %v2537_v45 = vld [vmem:[%s3092_s1 + $0x1b0] sm:$0xff]   ;;  %v2561_v49 = vld [vmem:[%s3092_s1 + $0x1a8] sm:$0xff]   ;;  %v2579_v52 = vld [vmem:[%s3092_s1 + $0x120] sm:$0xff]  }
  0x12   :  { %1714 = vmatprep.subr.bf16.mxu1 %v2399_v17  ;;  %700 = vmatprep.mubr.bf16.mxu1 %v1563_v37  ;;  %v2585_v53 = vld [vmem:[%s3092_s1 + $0x1a0] sm:$0xff]   ;;  %v2590_v54 = vld [vmem:[%s3092_s1 + $0x158] sm:$0xff]   ;;  %v2614_v58 = vld [vmem:[%s3092_s1 + $0x150] sm:$0xff]  }
  0x13   :  { %3155 = vst [vmem:[#allocation9_spill] sm:$0xff] %v2585_v53  ;;  %v2597_v55 = vld [vmem:[%s3092_s1 + $0x1d8] sm:$0xff]   ;;  %v2621_v59 = vld [vmem:[%s3092_s1 + $0x1d0] sm:$0xff]   ;;  %v2638_v62 = vld [vmem:[%s3092_s1 + $0x148] sm:$0xff]  }
  0x14   :  { %1693 = vmatpush3.bf16.msra.mxu0 %v2405_v18  ;;  %3156 = vst [vmem:[#allocation10_spill] sm:$0xff] %v2597_v55  ;;  %v2603_v56 = vld [vmem:[%s3092_s1 + $0x118] sm:$0xff]   ;;  %3158 = vst [vmem:[#allocation12_spill] sm:$0xff] %v2621_v59  ;;  %v2627_v60 = vld [vmem:[%s3092_s1 + $0x110] sm:$0xff]  }
  0x15   :  { %1715 = vmatpush3.bf16.msra.mxu1 %v2411_v19  ;;  %1694 = vmatprep.subr.bf16.mxu0 %v2417_v20  ;;  %v2609_v57 = vld [vmem:[%s3092_s1 + $0x198] sm:$0xff]   ;;  %v2633_v61 = vld [vmem:[%s3092_s1 + $0x190] sm:$0xff]   ;;  %v2645_v63 = vld [vmem:[%s3092_s1 + $0x1c8] sm:$0xff]  }
  0x16   :  { %1716 = vmatprep.subr.bf16.mxu1 %v2423_v21  ;;  %3157 = vst [vmem:[#allocation11_spill] sm:$0xff] %v2609_v57  ;;  %3159 = vst [vmem:[#allocation13_spill] sm:$0xff] %v2633_v61  ;;  %v2651_v32 = vld [vmem:[%s3092_s1 + $0x108] sm:$0xff]   ;;  %v2669_v35 = vld [vmem:[%s3092_s1 + $0x1c0] sm:$0xff]  }
  0x17   :  { %3160 = vst [vmem:[#allocation14_spill] sm:$0xff] %v2645_v63  ;;  %v2657_v33 = vld [vmem:[%s3092_s1 + $0x188] sm:$0xff]   ;;  %3162 = vst [vmem:[#allocation16_spill] sm:$0xff] %v2669_v35  ;;  %v2681_v37 = vld [vmem:[%s3092_s1 + $0x180] sm:$0xff]  }
  0x18   :  { %1695 = vmatpush3.bf16.msra.mxu0 %v2429_v22  ;;  %3161 = vst [vmem:[#allocation15_spill] sm:$0xff] %v2657_v33  ;;  %3164 = vst [vmem:[#allocation18_spill] sm:$0xff] %v2681_v37 }
  0x19   :  { %1717 = vmatpush3.bf16.msra.mxu1 %v2435_v23  ;;  %1696 = vmatprep.subr.bf16.mxu0 %v2441_v24 }
  0x1a   :  { %1718 = vmatprep.subr.bf16.mxu1 %v2447_v25 }
  0x1c   :  { %1697 = vmatpush3.bf16.msra.mxu0 %v2453_v26 }
  0x1d   :  { %1719 = vmatpush3.bf16.msra.mxu1 %v2459_v27  ;;  %1698 = vmatprep.subr.bf16.mxu0 %v2465_v28 }
  0x1e   :  { %1720 = vmatprep.subr.bf16.mxu1 %v2471_v29 }
  0x20   :  { %1699 = vmatpush3.bf16.msra.mxu0 %v2477_v30 }
  0x21   :  { %1721 = vmatpush3.bf16.msra.mxu1 %v2483_v31  ;;  %1728 = vmatprep.subr.bf16.mxu0 %v2496_v38 }
  0x22   :  { %1750 = vmatprep.subr.bf16.mxu1 %v2501_v39 }
  0x23   :  { %661 = vmatmul.mubr.bf16.vlgmr.msra.gmra.mxu0 %v1560_v34  ;;  %v2662_v34 = vld [vmem:[%s3092_s1 + $0x140] sm:$0xff]  }
  0x24   :  { %701 = vmatmul.mubr.bf16.vlgmr.msra.gmra.mxu1 %v1562_v36  ;;  %1729 = vmatpush3.bf16.msra.mxu0 %v2506_v40  ;;  %v2675_v36 = vld [vmem:[%s3092_s1 + $0x100] sm:$0xff]  }
  0x25   :  { %1751 = vmatpush3.bf16.msra.mxu1 %v2511_v41  ;;  %1730 = vmatprep.subr.bf16.mxu0 %v2518_v42  ;;  %3163 = vst [vmem:[#allocation17_spill] sm:$0xff] %v2675_v36 }
  0x26   :  { %1752 = vmatprep.subr.bf16.mxu1 %v2525_v43 }
  0x28   :  { %1731 = vmatpush3.bf16.msra.mxu0 %v2531_v44 }
  0x29   :  { %1753 = vmatpush3.bf16.msra.mxu1 %v2537_v45  ;;  %1732 = vmatprep.subr.bf16.mxu0 %v2542_v46 }
  0x2a   :  { %1754 = vmatprep.subr.bf16.mxu1 %v2549_v47 }
  0x2c   :  { %1733 = vmatpush3.bf16.msra.mxu0 %v2555_v48 }
  0x2d   :  { %1755 = vmatpush3.bf16.msra.mxu1 %v2561_v49  ;;  %1734 = vmatprep.subr.bf16.mxu0 %v2566_v50 }
  0x2e   :  { %1756 = vmatprep.subr.bf16.mxu1 %v2573_v51 }
  0x30   :  { %1735 = vmatpush3.bf16.msra.mxu0 %v2579_v52 }
  0x31   :  { %1757 = vmatpush3.bf16.msra.mxu1 %v2585_v53  ;;  %1736 = vmatprep.subr.bf16.mxu0 %v2590_v54  ;;  %v3124_v53 = vmov 0.0  }
  0x32   :  { %1758 = vmatprep.subr.bf16.mxu1 %v2597_v55  ;;  %v2694_v55 = vld [vmem:[%s3092_s1 + $0x238] sm:$0xff]  }
  0x33   :  { %3165 = vst [vmem:[#allocation19_spill] sm:$0xff] %v2694_v55 }
  0x34   :  { %1737 = vmatpush3.bf16.msra.mxu0 %v2603_v56 }
  0x35   :  { %1759 = vmatpush3.bf16.msra.mxu1 %v2609_v57  ;;  %1738 = vmatprep.subr.bf16.mxu0 %v2614_v58 }
  0x36   :  { %1760 = vmatprep.subr.bf16.mxu1 %v2621_v59  ;;  %v162_v59 = vld [vmem:[%s3093_s0 + $0x18] sm:$0xff] }
  0x37   :  { %v1567_v57 = vcombine.high %v162_v59, %v162_v59 }
  0x38   :  { %1739 = vmatpush3.bf16.msra.mxu0 %v2627_v60 }
  0x39   :  { %1761 = vmatpush3.bf16.msra.mxu1 %v2633_v61  ;;  %1740 = vmatprep.subr.bf16.mxu0 %v2638_v62 }
  0x3a   :  { %1762 = vmatprep.subr.bf16.mxu1 %v2645_v63  ;;  %780 = vmatprep.mubr.bf16.mxu1 %v1567_v57  ;;  %v2714_v57 = vld [vmem:[%s3092_s1 + $0x228] sm:$0xff]  }
  0x3b   :  { %3167 = vst [vmem:[#allocation21_spill] sm:$0xff] %v2714_v57 }
  0x3c   :  { %1741 = vmatpush3.bf16.msra.mxu0 %v2651_v32 }
  0x3d   :  { %1763 = vmatpush3.bf16.msra.mxu1 %v2657_v33  ;;  %1742 = vmatprep.subr.bf16.mxu0 %v2662_v34  ;;  %v161_v33 = vld [vmem:[%s3093_s0 + $0x10] sm:$0xff] }
  0x3e   :  { %1764 = vmatprep.subr.bf16.mxu1 %v2669_v35  ;;  %v1564_v63 = vcombine.low %v161_v33, %v161_v33  ;;  %v1565_v61 = vcombine.high %v161_v33, %v161_v33  ;;  %v1566_v35 = vcombine.low %v162_v59, %v162_v59  ;;  %v2703_v59 = vld [vmem:[%s3092_s1 + $0x230] sm:$0xff]   ;;  %v2726_v33 = vld [vmem:[%s3092_s1 + $0x220] sm:$0xff]  }
  0x3f   :  { %3166 = vst [vmem:[#allocation20_spill] sm:$0xff] %v2703_v59  ;;  %3168 = vst [vmem:[#allocation22_spill] sm:$0xff] %v2726_v33 }
  0x40   :  { %1743 = vmatpush3.bf16.msra.mxu0 %v2675_v36  ;;  %740 = vmatprep.mubr.bf16.mxu0 %v1565_v61  ;;  %v1641_v61 = vld [vmem:[%s3093_s0 + $0x24] sm:$0xff] }
  0x41   :  { %1765 = vmatpush3.bf16.msra.mxu1 %v2681_v37  ;;  %2072 = vmatprep.subr.bf16.mxu0 %v3124_v53 }
  0x42   :  { %1781 = vmatprep.subr.bf16.mxu1 %v2298_v0 }
  0x43   :  { %741 = vmatmul.mubr.bf16.vlgmr.msra.gmra.mxu0 %v1564_v63  ;;  %v1647_v63 = vcombine.high %v1641_v61, %v1641_v61 }
  0x44   :  { %781 = vmatmul.mubr.bf16.vlgmr.msra.gmra.mxu1 %v1566_v35  ;;  %2073 = vmatpush3.bf16.msra.mxu0 %v2694_v55  ;;  %v2735_v35 = vld [vmem:[%s3092_s1 + $0x218] sm:$0xff]  }
  0x45   :  { %1782 = vmatpush3.bf16.msra.mxu1 %v2309_v2  ;;  %2074 = vmatprep.subr.bf16.mxu0 %v3124_v53  ;;  %3169 = vst [vmem:[#allocation23_spill] sm:$0xff] %v2735_v35 }
  0x46   :  { %1783 = vmatprep.subr.bf16.mxu1 %v2321_v4  ;;  %2088 = vmatprep.mubr.msk.bf16.mxu0 %vm2274_vm0, %v3124_v53 }
  0x47   :  { %898 = vmatprep.mubr.bf16.mxu1 %v1647_v63  ;;  %v2744_v63 = vld [vmem:[%s3092_s1 + $0x210] sm:$0xff]  }
  0x48   :  { %2075 = vmatpush3.bf16.msra.mxu0 %v2703_v59  ;;  %3170 = vst [vmem:[#allocation24_spill] sm:$0xff] %v2744_v63 }
  0x49   :  { %1784 = vmatpush3.bf16.msra.mxu1 %v2333_v6  ;;  %2076 = vmatprep.subr.bf16.mxu0 %v3124_v53 }
  0x4a   :  { %1785 = vmatprep.subr.bf16.mxu1 %v2345_v8 }
  0x4c   :  { %2077 = vmatpush3.bf16.msra.mxu0 %v2714_v57 }
  0x4d   :  { %1786 = vmatpush3.bf16.msra.mxu1 %v2357_v10  ;;  %2078 = vmatprep.subr.bf16.mxu0 %v3124_v53 }
  0x4e   :  { %1787 = vmatprep.subr.bf16.mxu1 %v2369_v12 }
  0x50   :  { %2079 = vmatpush3.bf16.msra.mxu0 %v2726_v33 }
  0x51   :  { %1788 = vmatpush3.bf16.msra.mxu1 %v2381_v14  ;;  %2080 = vmatprep.subr.bf16.mxu0 %v3124_v53 }
  0x52   :  { %1789 = vmatprep.subr.bf16.mxu1 %v2393_v16  ;;  %v2753_v16 = vld [vmem:[%s3092_s1 + $0x208] sm:$0xff]  }
  0x53   :  { %3171 = vst [vmem:[#allocation25_spill] sm:$0xff] %v2753_v16 }
  0x54   :  { %2081 = vmatpush3.bf16.msra.mxu0 %v2735_v35 }
  0x55   :  { %1790 = vmatpush3.bf16.msra.mxu1 %v2405_v18  ;;  %2082 = vmatprep.subr.bf16.mxu0 %v3124_v53  ;;  %v1646_v18 = vcombine.low %v1641_v61, %v1641_v61 }
  0x56   :  { %1791 = vmatprep.subr.bf16.mxu1 %v2417_v20  ;;  %v2762_v20 = vld [vmem:[%s3092_s1 + $0x200] sm:$0xff]  }
  0x58   :  { %2083 = vmatpush3.bf16.msra.mxu0 %v2744_v63 }
  0x59   :  { %1792 = vmatpush3.bf16.msra.mxu1 %v2429_v22  ;;  %2084 = vmatprep.subr.bf16.mxu0 %v3124_v53  ;;  %v2234_v22 = vld [vmem:[%s3093_s0 + $0x20] ss:$0 sps:$4 sm:$0xff]  }
  0x5a   :  { %1793 = vmatprep.subr.bf16.mxu1 %v2441_v24  ;;  %v1642_v24 = vld [vmem:[%s3093_s0 + $0x2c] sm:$0xff] }
  0x5c   :  { %2085 = vmatpush3.bf16.msra.mxu0 %v2753_v16 }
  0x5d   :  { %1794 = vmatpush3.bf16.msra.mxu1 %v2453_v26  ;;  %2086 = vmatprep.subr.bf16.mxu0 %v3124_v53  ;;  %v1643_v26 = vld [vmem:[%s3093_s0 + $0x34] sm:$0xff]  ;;  %v1649_v53 = vcombine.high %v1642_v24, %v1642_v24 }
  0x5e   :  { %1795 = vmatprep.subr.bf16.mxu1 %v2465_v28  ;;  %v1651_v28 = vcombine.high %v1643_v26, %v1643_v26 }
  0x60   :  { %2087 = vmatpush3.bf16.msra.mxu0 %v2762_v20 }
  0x61   :  { %1796 = vmatpush3.bf16.msra.mxu1 %v2477_v30  ;;  %1803 = vmatprep.subr.bf16.mxu0 %v2303_v1 }
  0x62   :  { %1825 = vmatprep.subr.bf16.mxu1 %v2496_v38 }
  0x63   :  { %2089 = vmatmul.mubr.bf16.vlgmr.msra.gmra.mxu0 %v2234_v22  ;;  %v1650_v22 = vcombine.low %v1643_v26, %v1643_v26  ;;  %v3174_v26 = vld [vmem:[#allocation10_spill] sm:$0xff] }
  0x64   :  { %899 = vmatmul.mubr.bf16.vlgmr.msra.gmra.mxu1 %v1646_v18  ;;  %1804 = vmatpush3.bf16.msra.mxu0 %v2315_v3  ;;  %v1648_v18 = vcombine.low %v1642_v24, %v1642_v24  ;;  %v3173_v24 = vld [vmem:[#allocation9_spill] sm:$0xff] }
  0x65   :  { %1826 = vmatpush3.bf16.msra.mxu1 %v2506_v40  ;;  %1805 = vmatprep.subr.bf16.mxu0 %v2327_v5 }
  0x66   :  { %1827 = vmatprep.subr.bf16.mxu1 %v2518_v42  ;;  %938 = vmatprep.mubr.bf16.mxu0 %v1649_v53  ;;  %v3172_v53 = vmov 0.0  }
  0x67   :  { %978 = vmatprep.mubr.bf16.mxu1 %v1651_v28  ;;  %v1644_v28 = vld [vmem:[%s3093_s0 + $0x3c] sm:$0xff] }
  0x68   :  { %1806 = vmatpush3.bf16.msra.mxu0 %v2339_v7  ;;  %v1653_v61 = vcombine.high %v1644_v28, %v1644_v28 }
  0x69   :  { %1828 = vmatpush3.bf16.msra.mxu1 %v2531_v44  ;;  %1807 = vmatprep.subr.bf16.mxu0 %v2351_v9 }
  0x6a   :  { %1829 = vmatprep.subr.bf16.mxu1 %v2542_v46 }
  0x6c   :  { %1808 = vmatpush3.bf16.msra.mxu0 %v2363_v11 }
  0x6d   :  { %1830 = vmatpush3.bf16.msra.mxu1 %v2555_v48  ;;  %1809 = vmatprep.subr.bf16.mxu0 %v2375_v13 }
  0x6e   :  { %1831 = vmatprep.subr.bf16.mxu1 %v2566_v50 }
  0x70   :  { %1810 = vmatpush3.bf16.msra.mxu0 %v2387_v15 }
  0x71   :  { %1832 = vmatpush3.bf16.msra.mxu1 %v2579_v52  ;;  %1811 = vmatprep.subr.bf16.mxu0 %v2399_v17 }
  0x72   :  { %1833 = vmatprep.subr.bf16.mxu1 %v2590_v54 }
  0x74   :  { %1812 = vmatpush3.bf16.msra.mxu0 %v2411_v19 }
  0x75   :  { %1834 = vmatpush3.bf16.msra.mxu1 %v2603_v56  ;;  %1813 = vmatprep.subr.bf16.mxu0 %v2423_v21 }
  0x76   :  { %1835 = vmatprep.subr.bf16.mxu1 %v2614_v58 }
  0x78   :  { %1814 = vmatpush3.bf16.msra.mxu0 %v2435_v23 }
  0x79   :  { %1836 = vmatpush3.bf16.msra.mxu1 %v2627_v60  ;;  %1815 = vmatprep.subr.bf16.mxu0 %v2447_v25 }
  0x7a   :  { %1837 = vmatprep.subr.bf16.mxu1 %v2638_v62 }
  0x7c   :  { %1816 = vmatpush3.bf16.msra.mxu0 %v2459_v27 }
  0x7d   :  { %1838 = vmatpush3.bf16.msra.mxu1 %v2651_v32  ;;  %1817 = vmatprep.subr.bf16.mxu0 %v2471_v29 }
  0x7e   :  { %1839 = vmatprep.subr.bf16.mxu1 %v2662_v34 }
  0x80   :  { %1818 = vmatpush3.bf16.msra.mxu0 %v2483_v31 }
  0x81   :  { %1840 = vmatpush3.bf16.msra.mxu1 %v2675_v36  ;;  %1847 = vmatprep.subr.bf16.mxu0 %v2501_v39  ;;  %v1656_v36 = vld [vmem:[%s3093_s0 + $0x50] sm:$0xff] }
  0x82   :  { %2092 = vmatprep.subr.bf16.mxu1 %v3172_v53 }
  0x83   :  { %939 = vmatmul.mubr.bf16.vlgmr.msra.gmra.mxu0 %v1648_v18  ;;  %v3175_v18 = vld [vmem:[#allocation11_spill] sm:$0xff] }
  0x84   :  { %979 = vmatmul.mubr.bf16.vlgmr.msra.gmra.mxu1 %v1650_v22  ;;  %1848 = vmatpush3.bf16.msra.mxu0 %v2511_v41  ;;  %v3176_v22 = vld [vmem:[#allocation12_spill] sm:$0xff] }
  0x85   :  { %2093 = vmatpush3.bf16.msra.mxu1 %v2694_v55  ;;  %1849 = vmatprep.subr.bf16.mxu0 %v2525_v43  ;;  %v2243_v55 = vld [vmem:[%s3093_s0 + $0x44] ss:$0 sps:$4 sm:$0xff]  }
  0x86   :  { %2094 = vmatprep.subr.bf16.mxu1 %v3172_v53  ;;  %1018 = vmatprep.mubr.bf16.mxu0 %v1653_v61  ;;  %v3177_v61 = vld [vmem:[#allocation13_spill] sm:$0xff] }
  0x87   :  { %2108 = vmatprep.mubr.msk.bf16.mxu1 %vm2274_vm0, %v3172_v53 }
  0x88   :  { %1850 = vmatpush3.bf16.msra.mxu0 %v2537_v45 }
  0x89   :  { %2095 = vmatpush3.bf16.msra.mxu1 %v2703_v59  ;;  %1851 = vmatprep.subr.bf16.mxu0 %v2549_v47  ;;  %v3180_v59 = vld [vmem:[#allocation16_spill] sm:$0xff] }
  0x8a   :  { %2096 = vmatprep.subr.bf16.mxu1 %v3172_v53 }
  0x8c   :  { %1852 = vmatpush3.bf16.msra.mxu0 %v2561_v49 }
  0x8d   :  { %2097 = vmatpush3.bf16.msra.mxu1 %v2714_v57  ;;  %1853 = vmatprep.subr.bf16.mxu0 %v2573_v51  ;;  %v3178_v57 = vld [vmem:[#allocation14_spill] sm:$0xff] }
  0x8e   :  { %2098 = vmatprep.subr.bf16.mxu1 %v3172_v53 }
  0x90   :  { %1854 = vmatpush3.bf16.msra.mxu0 %v3173_v24 }
  0x91   :  { %2099 = vmatpush3.bf16.msra.mxu1 %v2726_v33  ;;  %1855 = vmatprep.subr.bf16.mxu0 %v3174_v26  ;;  %v3179_v33 = vld [vmem:[#allocation15_spill] sm:$0xff] }
  0x92   :  { %2100 = vmatprep.subr.bf16.mxu1 %v3172_v53 }
  0x94   :  { %1856 = vmatpush3.bf16.msra.mxu0 %v3175_v18 }
  0x95   :  { %2101 = vmatpush3.bf16.msra.mxu1 %v2735_v35  ;;  %1857 = vmatprep.subr.bf16.mxu0 %v3176_v22  ;;  %v1652_v35 = vcombine.low %v1644_v28, %v1644_v28 }
  0x96   :  { %2102 = vmatprep.subr.bf16.mxu1 %v3172_v53 }
  0x98   :  { %1858 = vmatpush3.bf16.msra.mxu0 %v3177_v61 }
  0x99   :  { %2103 = vmatpush3.bf16.msra.mxu1 %v2744_v63  ;;  %1859 = vmatprep.subr.bf16.mxu0 %v3178_v57  ;;  %v1655_v63 = vld [vmem:[%s3093_s0 + $0x48] sm:$0xff] }
  0x9a   :  { %2104 = vmatprep.subr.bf16.mxu1 %v3172_v53  ;;  %v1661_v28 = vcombine.high %v1655_v63, %v1655_v63 }
  0x9c   :  { %1860 = vmatpush3.bf16.msra.mxu0 %v3179_v33 }
  0x9d   :  { %2105 = vmatpush3.bf16.msra.mxu1 %v2753_v16  ;;  %1861 = vmatprep.subr.bf16.mxu0 %v3180_v59  ;;  %v1663_v16 = vcombine.high %v1656_v36, %v1656_v36 }
  0x9e   :  { %2106 = vmatprep.subr.bf16.mxu1 %v3172_v53 }
  0xa0   :  { %1862 = vmatpush3.bf16.msra.mxu0 %v2681_v37 }
  0xa1   :  { %2107 = vmatpush3.bf16.msra.mxu1 %v2762_v20  ;;  %1878 = vmatprep.subr.bf16.mxu0 %v2298_v0 }
  0xa2   :  { %1900 = vmatprep.subr.bf16.mxu1 %v2303_v1  ;;  %v3181_v1 = vld [vmem:[#allocation2_spill] sm:$0xff] }
  0xa3   :  { %1019 = vmatmul.mubr.bf16.vlgmr.msra.gmra.mxu0 %v1652_v35 }
  0xa4   :  { %2109 = vmatmul.mubr.bf16.vlgmr.msra.gmra.mxu1 %v2243_v55  ;;  %1879 = vmatpush3.bf16.msra.mxu0 %v2309_v2 }
  0xa5   :  { %1901 = vmatpush3.bf16.msra.mxu1 %v2315_v3  ;;  %1880 = vmatprep.subr.bf16.mxu0 %v2321_v4  ;;  %v3182_v3 = vld [vmem:[#allocation3_spill] sm:$0xff] }
  0xa6   :  { %1902 = vmatprep.subr.bf16.mxu1 %v2327_v5  ;;  %1136 = vmatprep.mubr.bf16.mxu0 %v1661_v28  ;;  %v3183_v5 = vld [vmem:[#allocation4_spill] sm:$0xff]  ;;  %v3188_v28 = vld [vmem:[#allocation17_spill] sm:$0xff] }
  0xa7   :  { %1176 = vmatprep.mubr.bf16.mxu1 %v1663_v16  ;;  %v1662_v16 = vcombine.low %v1656_v36, %v1656_v36 }
  0xa8   :  { %1881 = vmatpush3.bf16.msra.mxu0 %v2333_v6 }
  0xa9   :  { %1903 = vmatpush3.bf16.msra.mxu1 %v2339_v7  ;;  %1882 = vmatprep.subr.bf16.mxu0 %v2345_v8  ;;  %v3184_v7 = vld [vmem:[#allocation5_spill] sm:$0xff] }
  0xaa   :  { %1904 = vmatprep.subr.bf16.mxu1 %v2351_v9  ;;  %v3185_v9 = vld [vmem:[#allocation6_spill] sm:$0xff] }
  0xac   :  { %1883 = vmatpush3.bf16.msra.mxu0 %v2357_v10 }
  0xad   :  { %1905 = vmatpush3.bf16.msra.mxu1 %v2363_v11  ;;  %1884 = vmatprep.subr.bf16.mxu0 %v2369_v12  ;;  %v3186_v11 = vld [vmem:[#allocation7_spill] sm:$0xff] }
  0xae   :  { %1906 = vmatprep.subr.bf16.mxu1 %v2375_v13  ;;  %v3187_v13 = vld [vmem:[#allocation8_spill] sm:$0xff] }
  0xb0   :  { %1885 = vmatpush3.bf16.msra.mxu0 %v2381_v14 }
  0xb1   :  { %1907 = vmatpush3.bf16.msra.mxu1 %v2387_v15  ;;  %1886 = vmatprep.subr.bf16.mxu0 %v3181_v1  ;;  %v1660_v15 = vcombine.low %v1655_v63, %v1655_v63  ;;  %v2926_v63 = vld [vmem:[%s3093_s0 + $0x6c] sm:$0xff] }
  0xb2   :  { %1908 = vmatprep.subr.bf16.mxu1 %v2399_v17  ;;  %v1657_v17 = vld [vmem:[%s3093_s0 + $0x58] sm:$0xff] }
  0xb3   :  { %v1664_v36 = vcombine.low %v1657_v17, %v1657_v17 }
  0xb4   :  { %1887 = vmatpush3.bf16.msra.mxu0 %v3182_v3 }
  0xb5   :  { %1909 = vmatpush3.bf16.msra.mxu1 %v2411_v19  ;;  %1888 = vmatprep.subr.bf16.mxu0 %v3183_v5  ;;  %v1658_v19 = vld [vmem:[%s3093_s0 + $0x60] sm:$0xff] }
  0xb6   :  { %1910 = vmatprep.subr.bf16.mxu1 %v2423_v21  ;;  %v1665_v21 = vcombine.high %v1657_v17, %v1657_v17  ;;  %v1667_v55 = vcombine.high %v1658_v19, %v1658_v19  ;;  %v1666_v35 = vcombine.low %v1658_v19, %v1658_v19  ;;  %v3189_v17 = vld [vmem:[#allocation19_spill] sm:$0xff] }
  0xb8   :  { %1889 = vmatpush3.bf16.msra.mxu0 %v3184_v7 }
  0xb9   :  { %1911 = vmatpush3.bf16.msra.mxu1 %v2435_v23  ;;  %1890 = vmatprep.subr.bf16.mxu0 %v3185_v9 }
  0xba   :  { %1912 = vmatprep.subr.bf16.mxu1 %v2447_v25 }
  0xbc   :  { %1891 = vmatpush3.bf16.msra.mxu0 %v3186_v11 }
  0xbd   :  { %1913 = vmatpush3.bf16.msra.mxu1 %v2459_v27  ;;  %1892 = vmatprep.subr.bf16.mxu0 %v3187_v13 }
  0xbe   :  { %1914 = vmatprep.subr.bf16.mxu1 %v2471_v29 }
  0xc0   :  { %1893 = vmatpush3.bf16.msra.mxu0 %v2477_v30 }
  0xc1   :  { %1915 = vmatpush3.bf16.msra.mxu1 %v2483_v31  ;;  %1922 = vmatprep.subr.bf16.mxu0 %v2496_v38 }
  0xc2   :  { %1944 = vmatprep.subr.bf16.mxu1 %v2501_v39 }
  0xc3   :  { %1137 = vmatmul.mubr.bf16.vlgmr.msra.gmra.mxu0 %v1660_v15 }
  0xc4   :  { %1177 = vmatmul.mubr.bf16.vlgmr.msra.gmra.mxu1 %v1662_v16  ;;  %1923 = vmatpush3.bf16.msra.mxu0 %v2506_v40 }
  0xc5   :  { %1945 = vmatpush3.bf16.msra.mxu1 %v2511_v41  ;;  %1924 = vmatprep.subr.bf16.mxu0 %v2518_v42 }
  0xc6   :  { %1946 = vmatprep.subr.bf16.mxu1 %v2525_v43  ;;  %1216 = vmatprep.mubr.bf16.mxu0 %v1665_v21  ;;  %v1675_v21 = vcombine.high %v2926_v63, %v2926_v63 }
  0xc7   :  { %1256 = vmatprep.mubr.bf16.mxu1 %v1667_v55 }
  0xc8   :  { %1925 = vmatpush3.bf16.msra.mxu0 %v2531_v44 }
  0xc9   :  { %1947 = vmatpush3.bf16.msra.mxu1 %v2537_v45  ;;  %1926 = vmatprep.subr.bf16.mxu0 %v2542_v46 }
  0xca   :  { %1948 = vmatprep.subr.bf16.mxu1 %v2549_v47 }
  0xcc   :  { %1927 = vmatpush3.bf16.msra.mxu0 %v2555_v48 }
  0xcd   :  { %1949 = vmatpush3.bf16.msra.mxu1 %v2561_v49  ;;  %1928 = vmatprep.subr.bf16.mxu0 %v2566_v50 }
  0xce   :  { %1950 = vmatprep.subr.bf16.mxu1 %v2573_v51 }
  0xd0   :  { %1929 = vmatpush3.bf16.msra.mxu0 %v2579_v52 }
  0xd1   :  { %1951 = vmatpush3.bf16.msra.mxu1 %v3173_v24  ;;  %1930 = vmatprep.subr.bf16.mxu0 %v2590_v54 }
  0xd2   :  { %1952 = vmatprep.subr.bf16.mxu1 %v3174_v26 }
  0xd4   :  { %1931 = vmatpush3.bf16.msra.mxu0 %v2603_v56 }
  0xd5   :  { %1953 = vmatpush3.bf16.msra.mxu1 %v3175_v18  ;;  %1932 = vmatprep.subr.bf16.mxu0 %v2614_v58 }
  0xd6   :  { %1954 = vmatprep.subr.bf16.mxu1 %v3176_v22 }
  0xd8   :  { %1933 = vmatpush3.bf16.msra.mxu0 %v2627_v60 }
  0xd9   :  { %1955 = vmatpush3.bf16.msra.mxu1 %v3177_v61  ;;  %1934 = vmatprep.subr.bf16.mxu0 %v2638_v62 }
  0xda   :  { %1956 = vmatprep.subr.bf16.mxu1 %v3178_v57 }
  0xdc   :  { %1935 = vmatpush3.bf16.msra.mxu0 %v2651_v32 }
  0xdd   :  { %1957 = vmatpush3.bf16.msra.mxu1 %v3179_v33  ;;  %1936 = vmatprep.subr.bf16.mxu0 %v2662_v34 }
  0xde   :  { %1958 = vmatprep.subr.bf16.mxu1 %v3180_v59 }
  0xe0   :  { %1937 = vmatpush3.bf16.msra.mxu0 %v3188_v28 }
  0xe1   :  { %1959 = vmatpush3.bf16.msra.mxu1 %v2681_v37  ;;  %2112 = vmatprep.subr.bf16.mxu0 %v3172_v53 }
  0xe2   :  { %1975 = vmatprep.subr.bf16.mxu1 %v2298_v0 }
  0xe3   :  { %v1700_v15 = vpop.f32.mrf.mxu0  ;;  %1217 = vmatmul.mubr.bf16.vlgmr.msra.gmra.mxu0 %v1664_v36 }
  0xe4   :  { %v1722_v16 = vpop.f32.mrf.mxu1  ;;  %1257 = vmatmul.mubr.bf16.vlgmr.msra.gmra.mxu1 %v1666_v35  ;;  %2113 = vmatpush3.bf16.msra.mxu0 %v3189_v17  ;;  %v3190_v35 = vld [vmem:[#allocation20_spill] sm:$0xff] }
  0xe5   :  { %1976 = vmatpush3.bf16.msra.mxu1 %v2309_v2  ;;  %v1701_v19 = vpop.f32.mrf.mxu0  ;;  %2114 = vmatprep.subr.bf16.mxu0 %v3172_v53 }
  0xe6   :  { %v1723_v55 = vpop.f32.mrf.mxu1  ;;  %v1702_v59 = vadd.f32 %v1701_v19, %v1700_v15  ;;  %1977 = vmatprep.subr.bf16.mxu1 %v2321_v4  ;;  %2128 = vmatprep.mubr.msk.bf16.mxu0 %vm2274_vm0, %v3172_v53  ;;  %v3191_v15 = vld [vmem:[#allocation21_spill] sm:$0xff]  ;;  %v3192_v4 = vld [vmem:[#allocation22_spill] sm:$0xff] }
  0xe7   :  { %v1724_v33 = vadd.f32 %v1723_v55, %v1722_v16  ;;  %v1703_v0 = vpop.f32.mrf.mxu0  ;;  %1374 = vmatprep.mubr.bf16.mxu1 %v1675_v21 }
  0xe8   :  { %v1725_v37 = vpop.f32.mrf.mxu1  ;;  %2115 = vmatpush3.bf16.msra.mxu0 %v3190_v35 }
  0xe9   :  { %v703_v36 = vadd.f32 %v1724_v33, %v1702_v59  ;;  %1978 = vmatpush3.bf16.msra.mxu1 %v2333_v6  ;;  %v1704_v2 = vpop.f32.mrf.mxu0  ;;  %2116 = vmatprep.subr.bf16.mxu0 %v3172_v53  ;;  %v3193_v6 = vld [vmem:[#allocation23_spill] sm:$0xff]  ;;  %v2972_v37 = vld [vmem:[%s3093_s0 + $0x74] sm:$0xff]  ;;  %v2977_v59 = vld [vmem:[%s3093_s0 + $0x7c] sm:$0xff] }
  0xea   :  { %v1726_v57 = vpop.f32.mrf.mxu1  ;;  %1979 = vmatprep.subr.bf16.mxu1 %v2345_v8  ;;  %v3194_v8 = vld [vmem:[#allocation24_spill] sm:$0xff]  ;;  %v1677_v33 = vcombine.high %v2972_v37, %v2972_v37  ;;  %v2269_v2 = vld [vmem:[%s3092_s1 + $0xa0] sm:$0xff]  }
  0xeb   :  { %v2262_v57 = vld [vmem:[%s3092_s1 + $0xf8] sm:$0xff]  }
  0xec   :  { %2117 = vmatpush3.bf16.msra.mxu0 %v3191_v15 }
  0xed   :  { %1980 = vmatpush3.bf16.msra.mxu1 %v2357_v10  ;;  %2118 = vmatprep.subr.bf16.mxu0 %v3172_v53  ;;  %v3195_v10 = vld [vmem:[#allocation25_spill] sm:$0xff] }
  0xee   :  { %1981 = vmatprep.subr.bf16.mxu1 %v2369_v12  ;;  %v2252_v12 = vld [vmem:[%s3093_s0 + $0x68] ss:$0 sps:$4 sm:$0xff]  }
  0xf0   :  { %2119 = vmatpush3.bf16.msra.mxu0 %v3192_v4 }
  0xf1   :  { %1982 = vmatpush3.bf16.msra.mxu1 %v2381_v14  ;;  %2120 = vmatprep.subr.bf16.mxu0 %v3172_v53  ;;  %v1674_v14 = vcombine.low %v2926_v63, %v2926_v63 }
  0xf2   :  { %1983 = vmatprep.subr.bf16.mxu1 %v3181_v1  ;;  %v1679_v1 = vcombine.high %v2977_v59, %v2977_v59 }
  0xf4   :  { %2121 = vmatpush3.bf16.msra.mxu0 %v3193_v6 }
  0xf5   :  { %1984 = vmatpush3.bf16.msra.mxu1 %v3182_v3  ;;  %2122 = vmatprep.subr.bf16.mxu0 %v3172_v53 }
  0xf6   :  { %1985 = vmatprep.subr.bf16.mxu1 %v3183_v5 }
  0xf8   :  { %2123 = vmatpush3.bf16.msra.mxu0 %v3194_v8 }
  0xf9   :  { %1986 = vmatpush3.bf16.msra.mxu1 %v3184_v7  ;;  %2124 = vmatprep.subr.bf16.mxu0 %v3172_v53 }
  0xfa   :  { %1987 = vmatprep.subr.bf16.mxu1 %v3185_v9 }
  0xfc   :  { %2125 = vmatpush3.bf16.msra.mxu0 %v3195_v10 }
  0xfd   :  { %1988 = vmatpush3.bf16.msra.mxu1 %v3186_v11  ;;  %2126 = vmatprep.subr.bf16.mxu0 %v3172_v53 }
  0xfe   :  { %1989 = vmatprep.subr.bf16.mxu1 %v3187_v13 }
 0x100   :  { %2127 = vmatpush3.bf16.msra.mxu0 %v2762_v20 }
 0x101   :  { %1990 = vmatpush3.bf16.msra.mxu1 %v2477_v30  ;;  %1997 = vmatprep.subr.bf16.mxu0 %v2262_v57  ;;  %v2263_v30 = vld [vmem:[%s3092_s1 + $0xb8] sm:$0xff]  }
 0x102   :  { %2019 = vmatprep.subr.bf16.mxu1 %v2496_v38  ;;  %v2264_v38 = vld [vmem:[%s3092_s1 + $0xf0] sm:$0xff]  }
 0x103   :  { %v1744_v3 = vpop.f32.mrf.mxu0  ;;  %2129 = vmatmul.mubr.bf16.vlgmr.msra.gmra.mxu0 %v2252_v12 }
 0x104   :  { %v1766_v5 = vpop.f32.mrf.mxu1  ;;  %1375 = vmatmul.mubr.bf16.vlgmr.msra.gmra.mxu1 %v1674_v14  ;;  %1998 = vmatpush3.bf16.msra.mxu0 %v2263_v30 }
 0x105   :  { %2020 = vmatpush3.bf16.msra.mxu1 %v2506_v40  ;;  %v1745_v7 = vpop.f32.mrf.mxu0  ;;  %1999 = vmatprep.subr.bf16.mxu0 %v2264_v38  ;;  %v2265_v40 = vld [vmem:[%s3092_s1 + $0xb0] sm:$0xff]  }
 0x106   :  { %v1767_v9 = vpop.f32.mrf.mxu1  ;;  %2021 = vmatprep.subr.bf16.mxu1 %v2518_v42  ;;  %v1746_v11 = vadd.f32 %v1745_v7, %v1744_v3  ;;  %1414 = vmatprep.mubr.bf16.mxu0 %v1677_v33  ;;  %v2266_v42 = vld [vmem:[%s3092_s1 + $0xe8] sm:$0xff]  }
 0x107   :  { %v1768_v13 = vadd.f32 %v1767_v9, %v1766_v5  ;;  %1454 = vmatprep.mubr.bf16.mxu1 %v1679_v1  ;;  %v1747_v63 = vpop.f32.mrf.mxu0 }
 0x108   :  { %v1769_v16 = vpop.f32.mrf.mxu1  ;;  %v743_v21 = vadd.f32 %v1746_v11, %v703_v36  ;;  %2000 = vmatpush3.bf16.msra.mxu0 %v2265_v40  ;;  %v2267_v36 = vld [vmem:[%s3092_s1 + $0xa8] sm:$0xff]  }
 0x109   :  { %2022 = vmatpush3.bf16.msra.mxu1 %v2531_v44  ;;  %v1748_v19 = vpop.f32.mrf.mxu0  ;;  %2001 = vmatprep.subr.bf16.mxu0 %v2266_v42  ;;  %v2268_v44 = vld [vmem:[%s3092_s1 + $0xe0] sm:$0xff]  }
 0x10a   :  { %v1770_v55 = vpop.f32.mrf.mxu1  ;;  %2023 = vmatprep.subr.bf16.mxu1 %v2542_v46  ;;  %v783_v0 = vadd.f32 %v1768_v13, %v743_v21  ;;  %v2270_v46 = vld [vmem:[%s3092_s1 + $0xd8] sm:$0xff]  }
 0x10c   :  { %2002 = vmatpush3.bf16.msra.mxu0 %v2267_v36 }
 0x10d   :  { %2024 = vmatpush3.bf16.msra.mxu1 %v2555_v48  ;;  %2003 = vmatprep.subr.bf16.mxu0 %v2268_v44  ;;  %v2271_v48 = vld [vmem:[%s3092_s1 + $0x98] sm:$0xff]  }
 0x10e   :  { %2025 = vmatprep.subr.bf16.mxu1 %v2566_v50  ;;  %v2272_v50 = vld [vmem:[%s3092_s1 + $0xd0] sm:$0xff]  }
 0x110   :  { %2004 = vmatpush3.bf16.msra.mxu0 %v2269_v2 }
 0x111   :  { %2026 = vmatpush3.bf16.msra.mxu1 %v2579_v52  ;;  %2005 = vmatprep.subr.bf16.mxu0 %v2270_v46  ;;  %v1676_v52 = vcombine.low %v2972_v37, %v2972_v37 }
 0x112   :  { %2027 = vmatprep.subr.bf16.mxu1 %v2590_v54 }
 0x114   :  { %2006 = vmatpush3.bf16.msra.mxu0 %v2271_v48 }
 0x115   :  { %2028 = vmatpush3.bf16.msra.mxu1 %v2603_v56  ;;  %2007 = vmatprep.subr.bf16.mxu0 %v2272_v50 }
 0x116   :  { %2029 = vmatprep.subr.bf16.mxu1 %v2614_v58 }
 0x118   :  { %2008 = vmatpush3.bf16.msra.mxu0 %v2435_v23  ;;  %v1678_v23 = vcombine.low %v2977_v59, %v2977_v59 }
 0x119   :  { %2030 = vmatpush3.bf16.msra.mxu1 %v2627_v60  ;;  %2009 = vmatprep.subr.bf16.mxu0 %v2447_v25  ;;  %v1672_v25 = vld [vmem:[%s3093_s0 + $0x84] sm:$0xff] }
 0x11a   :  { %2031 = vmatprep.subr.bf16.mxu1 %v2638_v62 }
 0x11c   :  { %2010 = vmatpush3.bf16.msra.mxu0 %v2459_v27  ;;  %v1681_v27 = vcombine.high %v1672_v25, %v1672_v25 }
 0x11d   :  { %2032 = vmatpush3.bf16.msra.mxu1 %v2651_v32  ;;  %2011 = vmatprep.subr.bf16.mxu0 %v2471_v29 }
 0x11e   :  { %2033 = vmatprep.subr.bf16.mxu1 %v2662_v34  ;;  %v3199_v34 = vld [vmem:[#allocation18_spill] sm:$0xff] }
 0x120   :  { %2012 = vmatpush3.bf16.msra.mxu0 %v2483_v31 }
 0x121   :  { %2034 = vmatpush3.bf16.msra.mxu1 %v3188_v28  ;;  %2041 = vmatprep.subr.bf16.mxu0 %v2501_v39 }
 0x122   :  { %2132 = vmatprep.subr.bf16.mxu1 %v3172_v53 }
 0x123   :  { %v822_v29 = vpop.f32.mrf.mxu0  ;;  %1415 = vmatmul.mubr.bf16.vlgmr.msra.gmra.mxu0 %v1676_v52 }
 0x124   :  { %v1797_v54 = vpop.f32.mrf.mxu1  ;;  %1455 = vmatmul.mubr.bf16.vlgmr.msra.gmra.mxu1 %v1678_v23  ;;  %v3048_v56 = vadd.f32 %v822_v29, %v783_v0  ;;  %2042 = vmatpush3.bf16.msra.mxu0 %v2511_v41 }
 0x125   :  { %2133 = vmatpush3.bf16.msra.mxu1 %v3189_v17  ;;  %v2090_v58 = vpop.f32.mrf.mxu0  ;;  %2043 = vmatprep.subr.bf16.mxu0 %v2525_v43  ;;  %v3196_v43 = vld [vmem:[#allocation14_spill] sm:$0xff] }
 0x126   :  { %v1798_v60 = vpop.f32.mrf.mxu1  ;;  %2134 = vmatprep.subr.bf16.mxu1 %v3172_v53  ;;  %1494 = vmatprep.mubr.bf16.mxu0 %v1681_v27 }
 0x127   :  { %v1799_v31 = vadd.f32 %v1798_v60, %v1797_v54  ;;  %2148 = vmatprep.mubr.msk.bf16.mxu1 %vm2274_vm0, %v3172_v53  ;;  %v825_v39 = vpop.f32.mrf.mxu0 }
 0x128   :  { %v1800_v62 = vpop.f32.mrf.mxu1  ;;  %2044 = vmatpush3.bf16.msra.mxu0 %v2537_v45  ;;  %v3197_v45 = vld [vmem:[#allocation15_spill] sm:$0xff] }
 0x129   :  { %2135 = vmatpush3.bf16.msra.mxu1 %v3190_v35  ;;  %v2091_v41 = vpop.f32.mrf.mxu0  ;;  %2045 = vmatprep.subr.bf16.mxu0 %v2549_v47  ;;  %v3198_v47 = vld [vmem:[#allocation16_spill] sm:$0xff] }
 0x12a   :  { %v1801_v32 = vpop.f32.mrf.mxu1  ;;  %2136 = vmatprep.subr.bf16.mxu1 %v3172_v53 }
 0x12c   :  { %2046 = vmatpush3.bf16.msra.mxu0 %v2561_v49  ;;  %v1680_v49 = vcombine.low %v1672_v25, %v1672_v25 }
 0x12d   :  { %2137 = vmatpush3.bf16.msra.mxu1 %v3191_v15  ;;  %2047 = vmatprep.subr.bf16.mxu0 %v2573_v51  ;;  %v2261_v51 = vld [vmem:[%s3093_s0 + $0x8c] ss:$0 sps:$4 sm:$0xff]  }
 0x12e   :  { %2138 = vmatprep.subr.bf16.mxu1 %v3172_v53 }
 0x130   :  { %2048 = vmatpush3.bf16.msra.mxu0 %v3173_v24 }
 0x131   :  { %2139 = vmatpush3.bf16.msra.mxu1 %v3192_v4  ;;  %2049 = vmatprep.subr.bf16.mxu0 %v3174_v26 }
 0x132   :  { %2140 = vmatprep.subr.bf16.mxu1 %v3172_v53 }
 0x134   :  { %2050 = vmatpush3.bf16.msra.mxu0 %v3175_v18 }
 0x135   :  { %2141 = vmatpush3.bf16.msra.mxu1 %v3193_v6  ;;  %2051 = vmatprep.subr.bf16.mxu0 %v3176_v22 }
 0x136   :  { %2142 = vmatprep.subr.bf16.mxu1 %v3172_v53 }
 0x138   :  { %2052 = vmatpush3.bf16.msra.mxu0 %v3177_v61 }
 0x139   :  { %2143 = vmatpush3.bf16.msra.mxu1 %v3194_v8  ;;  %2053 = vmatprep.subr.bf16.mxu0 %v3196_v43 }
 0x13a   :  { %2144 = vmatprep.subr.bf16.mxu1 %v3172_v53 }
 0x13c   :  { %2054 = vmatpush3.bf16.msra.mxu0 %v3197_v45 }
 0x13d   :  { %2145 = vmatpush3.bf16.msra.mxu1 %v3195_v10  ;;  %2055 = vmatprep.subr.bf16.mxu0 %v3198_v47 }
 0x13e   :  { %2146 = vmatprep.subr.bf16.mxu1 %v3172_v53 }
 0x140   :  { %2056 = vmatpush3.bf16.msra.mxu0 %v3199_v34 }
 0x141   :  { %2147 = vmatpush3.bf16.msra.mxu1 %v2762_v20 }
 0x143   :  { %v1819_v24 = vpop.f32.mrf.mxu0  ;;  %1495 = vmatmul.mubr.bf16.vlgmr.msra.gmra.mxu0 %v1680_v49 }
 0x144   :  { %2149 = vmatmul.mubr.bf16.vlgmr.msra.gmra.mxu1 %v2261_v51  ;;  %v1841_v26 = vpop.f32.mrf.mxu1 }
 0x145   :  { %v1820_v18 = vpop.f32.mrf.mxu0 }
 0x146   :  { %v1842_v22 = vpop.f32.mrf.mxu1  ;;  %v1821_v61 = vadd.f32 %v1820_v18, %v1819_v24 }
 0x147   :  { %v1843_v28 = vadd.f32 %v1842_v22, %v1841_v26  ;;  %v1822_v17 = vpop.f32.mrf.mxu0 }
 0x148   :  { %v1844_v35 = vpop.f32.mrf.mxu1  ;;  %v941_v53 = vadd.f32 %v1821_v61, %v1799_v31 }
 0x149   :  { %v1823_v15 = vpop.f32.mrf.mxu0 }
 0x14a   :  { %v1845_v4 = vpop.f32.mrf.mxu1  ;;  %v981_v6 = vadd.f32 %v1843_v28, %v941_v53 }
 0x163   :  { %v1863_v8 = vpop.f32.mrf.mxu0 }
 0x164   :  { %v1060_v10 = vpop.f32.mrf.mxu1 }
 0x165   :  { %v1864_v12 = vpop.f32.mrf.mxu0 }
 0x166   :  { %v2110_v14 = vpop.f32.mrf.mxu1  ;;  %v1865_v37 = vadd.f32 %v1864_v12, %v1863_v8 }
 0x167   :  { %v1866_v20 = vpop.f32.mrf.mxu0 }
 0x168   :  { %v1063_v59 = vpop.f32.mrf.mxu1  ;;  %v1021_v57 = vadd.f32 %v1865_v37, %v981_v6  ;;  %v1683_v20 = vld [vmem:[%s3094_s2] ss:$0 sm:$0xff] }
 0x169   :  { %v1867_v33 = vpop.f32.mrf.mxu0 }
 0x16a   :  { %v2111_v1 = vpop.f32.mrf.mxu1  ;;  %v1061_v3 = vadd.f32 %v1060_v10, %v1021_v57 }
 0x16c   :  { %v1542_v5 = vmax.f32 %v3048_v56, %v1061_v3 }
 0x183   :  { %v1894_v30 = vpop.f32.mrf.mxu0 }
 0x184   :  { %v1916_v7 = vpop.f32.mrf.mxu1 }
 0x185   :  { %v1895_v9 = vpop.f32.mrf.mxu0 }
 0x186   :  { %v1917_v38 = vpop.f32.mrf.mxu1  ;;  %v1896_v11 = vadd.f32 %v1895_v9, %v1894_v30 }
 0x187   :  { %v1918_v13 = vadd.f32 %v1917_v38, %v1916_v7  ;;  %v1897_v63 = vpop.f32.mrf.mxu0 }
 0x188   :  { %v1919_v16 = vpop.f32.mrf.mxu1 }
 0x189   :  { %v1179_v21 = vadd.f32 %v1918_v13, %v1896_v11  ;;  %v1898_v40 = vpop.f32.mrf.mxu0 }
 0x18a   :  { %v1920_v19 = vpop.f32.mrf.mxu1 }
 0x1a3   :  { %v1938_v55 = vpop.f32.mrf.mxu0 }
 0x1a4   :  { %v1960_v42 = vpop.f32.mrf.mxu1 }
 0x1a5   :  { %v1939_v0 = vpop.f32.mrf.mxu0 }
 0x1a6   :  { %v1961_v36 = vpop.f32.mrf.mxu1  ;;  %v1940_v44 = vadd.f32 %v1939_v0, %v1938_v55 }
 0x1a7   :  { %v1962_v2 = vadd.f32 %v1961_v36, %v1960_v42  ;;  %v1941_v46 = vpop.f32.mrf.mxu0 }
 0x1a8   :  { %v1963_v48 = vpop.f32.mrf.mxu1  ;;  %v1219_v50 = vadd.f32 %v1940_v44, %v1179_v21 }
 0x1a9   :  { %v1942_v52 = vpop.f32.mrf.mxu0 }
 0x1aa   :  { %v1964_v23 = vpop.f32.mrf.mxu1  ;;  %v1259_v25 = vadd.f32 %v1962_v2, %v1219_v50 }
 0x1c3   :  { %v1298_v27 = vpop.f32.mrf.mxu0 }
 0x1c4   :  { %v1991_v29 = vpop.f32.mrf.mxu1  ;;  %v1299_v54 = vadd.f32 %v1298_v27, %v1259_v25 }
 0x1c5   :  { %v2130_v56 = vpop.f32.mrf.mxu0 }
 0x1c6   :  { %v1992_v58 = vpop.f32.mrf.mxu1 }
 0x1c7   :  { %v1301_v60 = vpop.f32.mrf.mxu0  ;;  %v1993_v26 = vadd.f32 %v1992_v58, %v1991_v29 }
 0x1c8   :  { %v1994_v31 = vpop.f32.mrf.mxu1 }
 0x1c9   :  { %v2131_v39 = vpop.f32.mrf.mxu0 }
 0x1ca   :  { %v1995_v62 = vpop.f32.mrf.mxu1 }
 0x1e3   :  { %v2013_v41 = vpop.f32.mrf.mxu0 }
 0x1e4   :  { %v2035_v32 = vpop.f32.mrf.mxu1 }
 0x1e5   :  { %v2014_v43 = vpop.f32.mrf.mxu0 }
 0x1e6   :  { %v2036_v45 = vpop.f32.mrf.mxu1  ;;  %v2015_v24 = vadd.f32 %v2014_v43, %v2013_v41 }
 0x1e7   :  { %v2016_v47 = vpop.f32.mrf.mxu0  ;;  %v2037_v22 = vadd.f32 %v2036_v45, %v2035_v32 }
 0x1e8   :  { %v2038_v49 = vpop.f32.mrf.mxu1  ;;  %v1417_v18 = vadd.f32 %v2015_v24, %v1993_v26 }
 0x1e9   :  { %v2017_v51 = vpop.f32.mrf.mxu0 }
 0x1ea   :  { %v2039_v34 = vpop.f32.mrf.mxu1  ;;  %v1457_v53 = vadd.f32 %v2037_v22, %v1417_v18 }
 0x203   :  { %v2057_v61 = vpop.f32.mrf.mxu0 }
 0x204   :  { %v1536_v28 = vpop.f32.mrf.mxu1 }
 0x205   :  { %v2058_v17 = vpop.f32.mrf.mxu0 }
 0x206   :  { %v2150_v35 = vpop.f32.mrf.mxu1  ;;  %v2059_v15 = vadd.f32 %v2058_v17, %v2057_v61 }
 0x207   :  { %v2060_v4 = vpop.f32.mrf.mxu0 }
 0x208   :  { %v1539_v6 = vpop.f32.mrf.mxu1  ;;  %v1497_v8 = vadd.f32 %v2059_v15, %v1457_v53 }
 0x209   :  { %v2061_v10 = vpop.f32.mrf.mxu0 }
 0x20a   :  { %v2151_v12 = vpop.f32.mrf.mxu1  ;;  %v1537_v14 = vadd.f32 %v1536_v28, %v1497_v8 }
 0x20c   :  { %v1543_v37 = vmax.f32 %v1299_v54, %v1537_v14 }
 0x20e   :  { %v1544_v59 = vmax.f32 %v1542_v5, %v1543_v37 }
 0x210   :  { %v1552_v57 = vadd.f32 %v1683_v20, %v1544_v59 }
 0x212   :  { %v1553_v33 = vmax.f32 %v1552_v57, 0.0 }
 0x214   :  { %v1554_v1 = vpack.c.bf16 %v1553_v33, %v1553_v33 }
 0x216   :  { %1555 = vst [vmem:[%s3095_s3] sm:$0xf] %v1554_v1 }

// kernel: reg_classifier1_forward.5
= control target key start
LH: loop header
LB: loop body
LE: loop exit
PB: predicated region body
PF: predicated region fallthrough
CT: control target
= control target key end

     0   :  { %10 = vsyncpa [#allocation4], 0  ;;  %s2713_s18 = smov 0   ;;  %s2715_s19 = smov 0   ;;  %s3153_s0 = inlined_call_operand.vmem [shape: bf16[2,512], index: 0, kind: input, shape index: {}]   ;;  %s3154_s1 = inlined_call_operand.vmem [shape: bf16[512,1024], index: 1, kind: input, shape index: {}]   ;;  %s3155_s2 = inlined_call_operand.vmem [shape: f32[1,1024], index: 2, kind: input, shape index: {}]   ;;  %s3156_s3 = inlined_call_operand.vmem [shape: bf16[1024,128], index: 3, kind: input, shape index: {}]   ;;  %s3157_s4 = inlined_call_operand.vmem [shape: f32[1,128], index: 4, kind: input, shape index: {}]   ;;  %s3158_s5 = inlined_call_operand.hbm [shape: f32[2,128], index: 5, kind: output, shape index: {}]  }
   0x1   :  { %s2717_s20 = smov 0  }
   0x2 LB: > { %s2231_s21 = sadd.s32 4294967295, %s2677_s20   ;;  %s28_s22 = sadd.s32 1, %s2673_s19  ;;  %s2677_s20 = sphi %s2717_s20, %s16_s20   ;;  %s2673_s19 = sphi %s2715_s19, %s3161_s19   ;;  %s2669_s18 = sphi %s2713_s18, %s3160_s18  }
   0x3   : > { %p29_p0 = scmp.ge.s32.totalorder %s28_s22, 2  ;;  %p2235_p1 = scmp.ge.s32.totalorder %s2677_s20, 1 }
   0x4   : > { %p242_p2 = scmp.lt.s32.totalorder %s2677_s20, 3 }
   0x5   : > { %s3163_s22 = smov (%p29_p0, %s28_s22), 0 }
   0x6   : > { %p243_p3 = pnand %p2235_p1, %p242_p2 }
   0x7   : > { %s2236_s23 = sshll.u32 (!%p243_p3), %s2669_s18, 1  ;;  %s2237_s24 = sshll.u32 (!%p243_p3), %s2669_s18, 5 }
   0x8   : > { %246 = sbr.rel (%p243_p3) target bundleno = 643 (0x283), region = 40  ;;  %p285_p4 = scmp.lt.s32.totalorder (!%p243_p3), %s2236_s23, 3 }
   0x9   : > { %p293_p5 = scmp.lt.s32.totalorder (!%p243_p3), %s2237_s24, 63  ;;  %p2240_p6 = scmp.ne.s32.totalorder (!%p243_p3), %s2669_s18, 0 }
   0xd   : > { %s3165_s23 = smov (!%p285_p4, %s2236_s23), 3  ;;  %s3167_s24 = smov (!%p293_p5, %s2237_s24), 63 }
   0xe   : > { %s289_s27 = scalar_lea.vmem %s3153_s0, %s3165_s23  ;;  %s2440_s28 = sshll.u32 %s3167_s24, 5 }
   0xf   : > { %s2745_s6 = scalar_lea.vmem %s3154_s1, %s2440_s28  ;;  %312 = sbr.rel (%p2240_p6) target bundleno = 22 (0x16), region = 44 }
  0x14   : > { %v2679_v0 = vmov 0.0  }
  0x15   : > { %313 = vst [vmem:[#allocation2] sm:$0xff] %v2679_v0  ;;  %314 = vst [vmem:[#allocation2 + $0x8] sm:$0xff] %v2679_v0 }
  0x16 PF: > { %v374_v1 = vld [vmem:[%s2745_s6 + $0x1c0] sm:$0xff]  ;;  %v375_v3 = vld [vmem:[%s2745_s6 + $0x1c8] sm:$0xff]  ;;  %v2680_v36 = vmov 1966171168   ;;  %v458_v38 = vlaneseq  ;;  %p2370_p7 = scmp.ne.s32.totalorder %s2669_s18, 1 }
  0x17   : > { %v378_v2 = vld [vmem:[%s2745_s6 + $0x1e0] sm:$0xff]  ;;  %v379_v5 = vld [vmem:[%s2745_s6 + $0x1e8] sm:$0xff]  ;;  %v456_v37 = vunpack.c.l.s4 %v2680_v36 }
  0x18   : > { %v2299_v4 = vcombine.high %v374_v1, %v378_v2  ;;  %v2298_v6 = vcombine.low %v374_v1, %v378_v2  ;;  %v366_v7 = vld [vmem:[%s2745_s6 + $0x180] sm:$0xff]  ;;  %v2301_v9 = vcombine.high %v375_v3, %v379_v5  ;;  %v2300_v10 = vcombine.low %v375_v3, %v379_v5  ;;  %v367_v12 = vld [vmem:[%s2745_s6 + $0x188] sm:$0xff] }
  0x19   : > { %v370_v8 = vld [vmem:[%s2745_s6 + $0x1a0] sm:$0xff]  ;;  %v371_v13 = vld [vmem:[%s2745_s6 + $0x1a8] sm:$0xff]  ;;  %v457_v47 = vunpack.c.0.s8 %v456_v37  ;;  %v2772_v48 = vshrl.u32 %v458_v38, 7 }
  0x1a   : > { %v2291_v11 = vcombine.high %v366_v7, %v370_v8  ;;  %v358_v14 = vld [vmem:[%s2745_s6 + $0x140] sm:$0xff]  ;;  %1111 = vmatprep.subr.bf16.mxu0 %v2299_v4  ;;  %v2293_v15 = vcombine.high %v367_v12, %v371_v13  ;;  %v359_v17 = vld [vmem:[%s2745_s6 + $0x148] sm:$0xff]  ;;  %1152 = vmatprep.subr.bf16.mxu1 %v2301_v9  ;;  %v2290_v19 = vcombine.low %v366_v7, %v370_v8 }
  0x1b   : > { %v362_v16 = vld [vmem:[%s2745_s6 + $0x160] sm:$0xff]  ;;  %v363_v18 = vld [vmem:[%s2745_s6 + $0x168] sm:$0xff]  ;;  %1112 = vmatpush1.bf16.msra.mxu0 %v2298_v6  ;;  %1153 = vmatpush1.bf16.msra.mxu1 %v2300_v10  ;;  %v2292_v20 = vcombine.low %v367_v12, %v371_v13  ;;  %v2779_v57 = vsub.s32 %v457_v47, %v2772_v48 }
  0x1c   : > { %1113 = vmatprep.subr.bf16.mxu0 %v2291_v11  ;;  %v2283_v21 = vcombine.high %v358_v14, %v362_v16  ;;  %1154 = vmatprep.subr.bf16.mxu1 %v2293_v15  ;;  %v2285_v22 = vcombine.high %v359_v17, %v363_v18  ;;  %v350_v23 = vld [vmem:[%s2745_s6 + $0x100] sm:$0xff]  ;;  %v351_v25 = vld [vmem:[%s2745_s6 + $0x108] sm:$0xff]  ;;  %v2282_v27 = vcombine.low %v358_v14, %v362_v16 }
  0x1d   : > { %v354_v24 = vld [vmem:[%s2745_s6 + $0x120] sm:$0xff]  ;;  %v355_v26 = vld [vmem:[%s2745_s6 + $0x128] sm:$0xff]  ;;  %v2284_v28 = vcombine.low %v359_v17, %v363_v18 }
  0x1e   : > { %v2275_v29 = vcombine.high %v350_v23, %v354_v24  ;;  %v2277_v30 = vcombine.high %v351_v25, %v355_v26  ;;  %v342_v31 = vld [vmem:[%s2745_s6 + $0xc0] sm:$0xff]  ;;  %v343_v33 = vld [vmem:[%s2745_s6 + $0xc8] sm:$0xff]  ;;  %v2274_v35 = vcombine.low %v350_v23, %v354_v24  ;;  %v2276_v39 = vcombine.low %v351_v25, %v355_v26 }
  0x1f   : > { %1114 = vmatpush1.bf16.msra.mxu0 %v2290_v19  ;;  %1155 = vmatpush1.bf16.msra.mxu1 %v2292_v20  ;;  %v346_v32 = vld [vmem:[%s2745_s6 + $0xe0] sm:$0xff]  ;;  %v347_v34 = vld [vmem:[%s2745_s6 + $0xe8] sm:$0xff] }
  0x20   : > { %1115 = vmatprep.subr.bf16.mxu0 %v2283_v21  ;;  %1156 = vmatprep.subr.bf16.mxu1 %v2285_v22  ;;  %v2267_v40 = vcombine.high %v342_v31, %v346_v32  ;;  %v2269_v41 = vcombine.high %v343_v33, %v347_v34  ;;  %v334_v42 = vld [vmem:[%s2745_s6 + $0x80] sm:$0xff]  ;;  %v335_v44 = vld [vmem:[%s2745_s6 + $0x88] sm:$0xff]  ;;  %v2266_v46 = vcombine.low %v342_v31, %v346_v32 }
  0x21   : > { %v338_v43 = vld [vmem:[%s2745_s6 + $0xa0] sm:$0xff]  ;;  %v339_v45 = vld [vmem:[%s2745_s6 + $0xa8] sm:$0xff]  ;;  %v2268_v49 = vcombine.low %v343_v33, %v347_v34 }
  0x22   : > { %v2259_v50 = vcombine.high %v334_v42, %v338_v43  ;;  %v2261_v51 = vcombine.high %v335_v44, %v339_v45  ;;  %v326_v52 = vld [vmem:[%s2745_s6 + $0x40] sm:$0xff]  ;;  %v327_v54 = vld [vmem:[%s2745_s6 + $0x48] sm:$0xff]  ;;  %v2258_v56 = vcombine.low %v334_v42, %v338_v43  ;;  %v2260_v58 = vcombine.low %v335_v44, %v339_v45 }
  0x23   : > { %1116 = vmatpush1.bf16.msra.mxu0 %v2282_v27  ;;  %1157 = vmatpush1.bf16.msra.mxu1 %v2284_v28  ;;  %v330_v53 = vld [vmem:[%s2745_s6 + $0x60] sm:$0xff]  ;;  %v331_v55 = vld [vmem:[%s2745_s6 + $0x68] sm:$0xff] }
  0x24   : > { %1117 = vmatprep.subr.bf16.mxu0 %v2275_v29  ;;  %1158 = vmatprep.subr.bf16.mxu1 %v2277_v30  ;;  %v2251_v59 = vcombine.high %v326_v52, %v330_v53  ;;  %v2786_v60 = vld.sshfl [vmem:[%s289_s27] sm:$0x11 pattern:$0x75316420]  ;;  %v2253_v61 = vcombine.high %v327_v54, %v331_v55  ;;  %v319_v1 = vld [vmem:[%s2745_s6 + $0x8] sm:$0xff]  ;;  %v2250_v3 = vcombine.low %v326_v52, %v330_v53 }
  0x25   : > { %v318_v62 = vld [vmem:[%s2745_s6] sm:$0xff]  ;;  %v454_v0 = vcombine.high %v2786_v60, %v2786_v60  ;;  %v323_v2 = vld [vmem:[%s2745_s6 + $0x28] sm:$0xff]  ;;  %v2252_v5 = vcombine.low %v327_v54, %v331_v55 }
  0x26   : > { %v322_v63 = vld [vmem:[%s2745_s6 + $0x20] sm:$0xff]  ;;  %v2245_v7 = vcombine.high %v319_v1, %v323_v2  ;;  %v439_v10 = vld [vmem:[%s2745_s6 + $0x3c8] sm:$0xff]  ;;  %v2244_v13 = vcombine.low %v319_v1, %v323_v2 }
  0x27   : > { %1118 = vmatpush1.bf16.msra.mxu0 %v2274_v35  ;;  %1159 = vmatpush1.bf16.msra.mxu1 %v2276_v39  ;;  %v2795_v4 = vrot.slane %v454_v0, %v2779_v57  ;;  %v2243_v6 = vcombine.high %v318_v62, %v322_v63  ;;  %v438_v8 = vld [vmem:[%s2745_s6 + $0x3c0] sm:$0xff]  ;;  %v443_v11 = vld [vmem:[%s2745_s6 + $0x3e8] sm:$0xff]  ;;  %v2242_v12 = vcombine.low %v318_v62, %v322_v63 }
  0x28   : > { %1119 = vmatprep.subr.bf16.mxu0 %v2267_v40  ;;  %1160 = vmatprep.subr.bf16.mxu1 %v2269_v41  ;;  %v442_v9 = vld [vmem:[%s2745_s6 + $0x3e0] sm:$0xff]  ;;  %v2365_v15 = vcombine.high %v439_v10, %v443_v11  ;;  %v431_v18 = vld [vmem:[%s2745_s6 + $0x388] sm:$0xff]  ;;  %v2364_v21 = vcombine.low %v439_v10, %v443_v11 }
  0x29   : > { %1143 = vmatprep.mubr.bf16.mxu0 %v2795_v4  ;;  %1184 = vmatprep.mubr.bf16.mxu1 %v2795_v4  ;;  %v2363_v14 = vcombine.high %v438_v8, %v442_v9  ;;  %v430_v16 = vld [vmem:[%s2745_s6 + $0x380] sm:$0xff]  ;;  %v435_v19 = vld [vmem:[%s2745_s6 + $0x3a8] sm:$0xff]  ;;  %v2362_v20 = vcombine.low %v438_v8, %v442_v9 }
  0x2a   : > { %v434_v17 = vld [vmem:[%s2745_s6 + $0x3a0] sm:$0xff]  ;;  %v2357_v23 = vcombine.high %v431_v18, %v435_v19  ;;  %v423_v26 = vld [vmem:[%s2745_s6 + $0x348] sm:$0xff]  ;;  %v2356_v29 = vcombine.low %v431_v18, %v435_v19 }
  0x2b   : > { %1120 = vmatpush1.bf16.msra.mxu0 %v2266_v46  ;;  %1161 = vmatpush1.bf16.msra.mxu1 %v2268_v49  ;;  %v2355_v22 = vcombine.high %v430_v16, %v434_v17  ;;  %v422_v24 = vld [vmem:[%s2745_s6 + $0x340] sm:$0xff]  ;;  %v427_v27 = vld [vmem:[%s2745_s6 + $0x368] sm:$0xff]  ;;  %v2354_v28 = vcombine.low %v430_v16, %v434_v17 }
  0x2c   : > { %1121 = vmatprep.subr.bf16.mxu0 %v2259_v50  ;;  %1162 = vmatprep.subr.bf16.mxu1 %v2261_v51  ;;  %v426_v25 = vld [vmem:[%s2745_s6 + $0x360] sm:$0xff]  ;;  %v2349_v31 = vcombine.high %v423_v26, %v427_v27  ;;  %v415_v34 = vld [vmem:[%s2745_s6 + $0x308] sm:$0xff]  ;;  %v2348_v37 = vcombine.low %v423_v26, %v427_v27 }
  0x2d   : > { %v2347_v30 = vcombine.high %v422_v24, %v426_v25  ;;  %v414_v32 = vld [vmem:[%s2745_s6 + $0x300] sm:$0xff]  ;;  %v419_v35 = vld [vmem:[%s2745_s6 + $0x328] sm:$0xff]  ;;  %v2346_v36 = vcombine.low %v422_v24, %v426_v25  ;;  %v373_v24 = vld [vmem:[%s2745_s6 + $0x1b8] sm:$0xff] }
  0x2e   : > { %v418_v33 = vld [vmem:[%s2745_s6 + $0x320] sm:$0xff]  ;;  %v2341_v39 = vcombine.high %v415_v34, %v419_v35  ;;  %v407_v42 = vld [vmem:[%s2745_s6 + $0x2c8] sm:$0xff]  ;;  %v2340_v45 = vcombine.low %v415_v34, %v419_v35  ;;  %v352_v35 = vld [vmem:[%s2745_s6 + $0x110] sm:$0xff] }
  0x2f   : > { %1122 = vmatpush1.bf16.msra.mxu0 %v2258_v56  ;;  %1163 = vmatpush1.bf16.msra.mxu1 %v2260_v58  ;;  %v2339_v38 = vcombine.high %v414_v32, %v418_v33  ;;  %v406_v40 = vld [vmem:[%s2745_s6 + $0x2c0] sm:$0xff]  ;;  %v411_v43 = vld [vmem:[%s2745_s6 + $0x2e8] sm:$0xff]  ;;  %v2338_v44 = vcombine.low %v414_v32, %v418_v33 }
  0x30   : > { %1123 = vmatprep.subr.bf16.mxu0 %v2251_v59  ;;  %1164 = vmatprep.subr.bf16.mxu1 %v2253_v61  ;;  %v410_v41 = vld [vmem:[%s2745_s6 + $0x2e0] sm:$0xff]  ;;  %v2333_v47 = vcombine.high %v407_v42, %v411_v43  ;;  %v399_v51 = vld [vmem:[%s2745_s6 + $0x288] sm:$0xff]  ;;  %v2332_v54 = vcombine.low %v407_v42, %v411_v43  ;;  %v344_v43 = vld [vmem:[%s2745_s6 + $0xd0] sm:$0xff] }
  0x31   : > { %v2331_v46 = vcombine.high %v406_v40, %v410_v41  ;;  %v398_v49 = vld [vmem:[%s2745_s6 + $0x280] sm:$0xff]  ;;  %v403_v52 = vld [vmem:[%s2745_s6 + $0x2a8] sm:$0xff]  ;;  %v2330_v53 = vcombine.low %v406_v40, %v410_v41 }
  0x32   : > { %v402_v50 = vld [vmem:[%s2745_s6 + $0x2a0] sm:$0xff]  ;;  %v2325_v56 = vcombine.high %v399_v51, %v403_v52  ;;  %v391_v61 = vld [vmem:[%s2745_s6 + $0x248] sm:$0xff]  ;;  %v2324_v0 = vcombine.low %v399_v51, %v403_v52  ;;  %v336_v51 = vld [vmem:[%s2745_s6 + $0x90] sm:$0xff] }
  0x33   : > { %1124 = vmatpush1.bf16.msra.mxu0 %v2250_v3  ;;  %1165 = vmatpush1.bf16.msra.mxu1 %v2252_v5  ;;  %v2323_v55 = vcombine.high %v398_v49, %v402_v50  ;;  %v390_v58 = vld [vmem:[%s2745_s6 + $0x240] sm:$0xff]  ;;  %v395_v62 = vld [vmem:[%s2745_s6 + $0x268] sm:$0xff]  ;;  %v2322_v63 = vcombine.low %v398_v49, %v402_v50  ;;  %v340_v52 = vld [vmem:[%s2745_s6 + $0xb0] sm:$0xff] }
  0x34   : > { %1125 = vmatprep.subr.bf16.mxu0 %v2243_v6  ;;  %1166 = vmatprep.subr.bf16.mxu1 %v2245_v7  ;;  %v394_v59 = vld [vmem:[%s2745_s6 + $0x260] sm:$0xff]  ;;  %v2317_v2 = vcombine.high %v391_v61, %v395_v62  ;;  %v383_v6 = vld [vmem:[%s2745_s6 + $0x208] sm:$0xff]  ;;  %v2316_v9 = vcombine.low %v391_v61, %v395_v62  ;;  %v328_v61 = vld [vmem:[%s2745_s6 + $0x50] sm:$0xff] }
  0x35   : > { %v2315_v1 = vcombine.high %v390_v58, %v394_v59  ;;  %v382_v3 = vld [vmem:[%s2745_s6 + $0x200] sm:$0xff]  ;;  %v387_v7 = vld [vmem:[%s2745_s6 + $0x228] sm:$0xff]  ;;  %v2314_v8 = vcombine.low %v390_v58, %v394_v59  ;;  %v2263_v58 = vcombine.high %v336_v51, %v340_v52  ;;  %v332_v62 = vld [vmem:[%s2745_s6 + $0x70] sm:$0xff] }
  0x36   : > { %v386_v5 = vld [vmem:[%s2745_s6 + $0x220] sm:$0xff]  ;;  %v2309_v11 = vcombine.high %v383_v6, %v387_v7  ;;  %v2308_v17 = vcombine.low %v383_v6, %v387_v7  ;;  %v320_v6 = vld [vmem:[%s2745_s6 + $0x10] sm:$0xff] }
  0x37   : > { %1126 = vmatpush1.bf16.msra.mxu0 %v2242_v12  ;;  %1167 = vmatpush1.bf16.msra.mxu1 %v2244_v13  ;;  %v2307_v10 = vcombine.high %v382_v3, %v386_v5  ;;  %v376_v12 = vld [vmem:[%s2745_s6 + $0x1d0] sm:$0xff]  ;;  %v2306_v16 = vcombine.low %v382_v3, %v386_v5  ;;  %v2255_v3 = vcombine.high %v328_v61, %v332_v62 }
  0x38   : > { %1127 = vmatprep.subr.bf16.mxu0 %v2363_v14  ;;  %1168 = vmatprep.subr.bf16.mxu1 %v2365_v15  ;;  %v380_v13 = vld [vmem:[%s2745_s6 + $0x1f0] sm:$0xff]  ;;  %v377_v14 = vld [vmem:[%s2745_s6 + $0x1d8] sm:$0xff] }
  0x39   : > { %v381_v15 = vld [vmem:[%s2745_s6 + $0x1f8] sm:$0xff]  ;;  %v2303_v18 = vcombine.high %v376_v12, %v380_v13  ;;  %v2302_v25 = vcombine.low %v376_v12, %v380_v13  ;;  %v324_v7 = vld [vmem:[%s2745_s6 + $0x30] sm:$0xff] }
  0x3a   : > { %v2305_v19 = vcombine.high %v377_v14, %v381_v15  ;;  %v2304_v26 = vcombine.low %v377_v14, %v381_v15  ;;  %v2247_v12 = vcombine.high %v320_v6, %v324_v7  ;;  %v440_v14 = vld [vmem:[%s2745_s6 + $0x3d0] sm:$0xff] }
  0x3b   : > { %1128 = vmatpush2.bf16.msra.mxu0 %v2362_v20  ;;  %1169 = vmatpush2.bf16.msra.mxu1 %v2364_v21  ;;  %v368_v20 = vld [vmem:[%s2745_s6 + $0x190] sm:$0xff] }
  0x3c   : > { %1129 = vmatprep.subr.bf16.mxu0 %v2355_v22  ;;  %1170 = vmatprep.subr.bf16.mxu1 %v2357_v23  ;;  %v372_v21 = vld [vmem:[%s2745_s6 + $0x1b0] sm:$0xff]  ;;  %v2839_v22 = vrot.slane %v2786_v60, %v2779_v57  ;;  %v369_v23 = vld [vmem:[%s2745_s6 + $0x198] sm:$0xff] }
  0x3d   : > { %v2295_v27 = vcombine.high %v368_v20, %v372_v21  ;;  %v361_v57 = vld [vmem:[%s2745_s6 + $0x158] sm:$0xff]  ;;  %v2296_v32 = vcombine.low %v369_v23, %v373_v24  ;;  %v444_v15 = vld [vmem:[%s2745_s6 + $0x3f0] sm:$0xff] }
  0x3e   : > { %v365_v60 = vld [vmem:[%s2745_s6 + $0x178] sm:$0xff] }
  0x3f   : > { %1130 = vmatpush2.bf16.msra.mxu0 %v2354_v28  ;;  %1171 = vmatpush2.bf16.msra.mxu1 %v2356_v29  ;;  %v2297_v28 = vcombine.high %v369_v23, %v373_v24  ;;  %v360_v29 = vld [vmem:[%s2745_s6 + $0x150] sm:$0xff]  ;;  %v2289_v34 = vcombine.high %v361_v57, %v365_v60  ;;  %v2288_v40 = vcombine.low %v361_v57, %v365_v60 }
  0x40   : > { %1131 = vmatprep.subr.bf16.mxu0 %v2347_v30  ;;  %1172 = vmatprep.subr.bf16.mxu1 %v2349_v31  ;;  %v364_v30 = vld [vmem:[%s2745_s6 + $0x170] sm:$0xff]  ;;  %v2294_v31 = vcombine.low %v368_v20, %v372_v21  ;;  %v2367_v20 = vcombine.high %v440_v14, %v444_v15 }
  0x41   : > { %v2287_v33 = vcombine.high %v360_v29, %v364_v30  ;;  %v432_v23 = vld [vmem:[%s2745_s6 + $0x390] sm:$0xff] }
  0x42   : > { %v436_v24 = vld [vmem:[%s2745_s6 + $0x3b0] sm:$0xff] }
  0x43   : > { %1132 = vmatpush2.bf16.msra.mxu0 %v2346_v36  ;;  %1173 = vmatpush2.bf16.msra.mxu1 %v2348_v37  ;;  %v356_v36 = vld [vmem:[%s2745_s6 + $0x130] sm:$0xff]  ;;  %v353_v37 = vld [vmem:[%s2745_s6 + $0x118] sm:$0xff] }
  0x44   : > { %1133 = vmatprep.subr.bf16.mxu0 %v2339_v38  ;;  %1174 = vmatprep.subr.bf16.mxu1 %v2341_v39  ;;  %v357_v38 = vld [vmem:[%s2745_s6 + $0x138] sm:$0xff]  ;;  %v2286_v39 = vcombine.low %v360_v29, %v364_v30  ;;  %v2279_v41 = vcombine.high %v352_v35, %v356_v36  ;;  %v2359_v29 = vcombine.high %v432_v23, %v436_v24  ;;  %v424_v57 = vld [vmem:[%s2745_s6 + $0x350] sm:$0xff] }
  0x45   : > { %v2281_v42 = vcombine.high %v353_v37, %v357_v38  ;;  %v428_v60 = vld [vmem:[%s2745_s6 + $0x370] sm:$0xff] }
  0x47   : > { %1134 = vmatpush2.bf16.msra.mxu0 %v2338_v44  ;;  %1175 = vmatpush2.bf16.msra.mxu1 %v2340_v45  ;;  %v348_v44 = vld [vmem:[%s2745_s6 + $0xf0] sm:$0xff]  ;;  %v345_v45 = vld [vmem:[%s2745_s6 + $0xd8] sm:$0xff] }
  0x48   : > { %1135 = vmatprep.subr.bf16.mxu0 %v2331_v46  ;;  %1176 = vmatprep.subr.bf16.mxu1 %v2333_v47  ;;  %v349_v46 = vld [vmem:[%s2745_s6 + $0xf8] sm:$0xff]  ;;  %v2278_v47 = vcombine.low %v352_v35, %v356_v36  ;;  %v2271_v49 = vcombine.high %v344_v43, %v348_v44  ;;  %v2351_v35 = vcombine.high %v424_v57, %v428_v60 }
  0x49   : > { %v2273_v50 = vcombine.high %v345_v45, %v349_v46 }
  0x4b   : > { %1136 = vmatpush2.bf16.msra.mxu0 %v2330_v53  ;;  %1177 = vmatpush2.bf16.msra.mxu1 %v2332_v54  ;;  %v337_v53 = vld [vmem:[%s2745_s6 + $0x98] sm:$0xff] }
  0x4c   : > { %1137 = vmatprep.subr.bf16.mxu0 %v2323_v55  ;;  %1178 = vmatprep.subr.bf16.mxu1 %v2325_v56  ;;  %v341_v54 = vld [vmem:[%s2745_s6 + $0xb8] sm:$0xff]  ;;  %v2270_v55 = vcombine.low %v344_v43, %v348_v44  ;;  %v2272_v56 = vcombine.low %v345_v45, %v349_v46  ;;  %v408_v45 = vld [vmem:[%s2745_s6 + $0x2d0] sm:$0xff] }
  0x4d   : > { %v2265_v59 = vcombine.high %v337_v53, %v341_v54  ;;  %v412_v46 = vld [vmem:[%s2745_s6 + $0x2f0] sm:$0xff] }
  0x4f   : > { %1138 = vmatpush2.bf16.msra.mxu0 %v2322_v63  ;;  %1179 = vmatpush2.bf16.msra.mxu1 %v2324_v0  ;;  %v329_v63 = vld [vmem:[%s2745_s6 + $0x58] sm:$0xff] }
  0x50   : > { %1139 = vmatprep.subr.bf16.mxu0 %v2315_v1  ;;  %1180 = vmatprep.subr.bf16.mxu1 %v2317_v2  ;;  %v333_v0 = vld [vmem:[%s2745_s6 + $0x78] sm:$0xff]  ;;  %v2262_v1 = vcombine.low %v336_v51, %v340_v52  ;;  %v2264_v2 = vcombine.low %v337_v53, %v341_v54  ;;  %v2335_v51 = vcombine.high %v408_v45, %v412_v46  ;;  %v400_v53 = vld [vmem:[%s2745_s6 + $0x290] sm:$0xff] }
  0x51   : > { %v2257_v5 = vcombine.high %v329_v63, %v333_v0  ;;  %v404_v54 = vld [vmem:[%s2745_s6 + $0x2b0] sm:$0xff] }
  0x53   : > { %1140 = vmatpush2.bf16.msra.mxu0 %v2314_v8  ;;  %1181 = vmatpush2.bf16.msra.mxu1 %v2316_v9  ;;  %v321_v8 = vld [vmem:[%s2745_s6 + $0x18] sm:$0xff] }
  0x54   : > { %1141 = vmatprep.subr.bf16.mxu0 %v2307_v10  ;;  %1182 = vmatprep.subr.bf16.mxu1 %v2309_v11  ;;  %v325_v9 = vld [vmem:[%s2745_s6 + $0x38] sm:$0xff]  ;;  %v2254_v10 = vcombine.low %v328_v61, %v332_v62  ;;  %v2256_v11 = vcombine.low %v329_v63, %v333_v0  ;;  %v2327_v61 = vcombine.high %v400_v53, %v404_v54  ;;  %v392_v63 = vld [vmem:[%s2745_s6 + $0x250] sm:$0xff] }
  0x55   : > { %v2249_v13 = vcombine.high %v321_v8, %v325_v9  ;;  %v396_v0 = vld [vmem:[%s2745_s6 + $0x270] sm:$0xff] }
  0x57   : > { %1142 = vmatpush2.bf16.msra.mxu0 %v2306_v16  ;;  %1183 = vmatpush2.bf16.msra.mxu1 %v2308_v17  ;;  %v441_v16 = vld [vmem:[%s2745_s6 + $0x3d8] sm:$0xff] }
  0x58   : > { %1193 = vmatprep.subr.bf16.mxu0 %v2303_v18  ;;  %1234 = vmatprep.subr.bf16.mxu1 %v2305_v19  ;;  %v445_v17 = vld [vmem:[%s2745_s6 + $0x3f8] sm:$0xff]  ;;  %v2246_v18 = vcombine.low %v320_v6, %v324_v7  ;;  %v2248_v19 = vcombine.low %v321_v8, %v325_v9  ;;  %v2319_v6 = vcombine.high %v392_v63, %v396_v0  ;;  %v384_v8 = vld [vmem:[%s2745_s6 + $0x210] sm:$0xff] }
  0x59   : > { %v2369_v21 = vcombine.high %v441_v16, %v445_v17  ;;  %v388_v9 = vld [vmem:[%s2745_s6 + $0x230] sm:$0xff] }
  0x5a   : > { %1144 = vmatmul.mubr.bf16.vlgmr.msra.gmra.mxu0 %v2839_v22  ;;  %1185 = vmatmul.mubr.bf16.vlgmr.msra.gmra.mxu1 %v2839_v22 }
  0x5b   : > { %1194 = vmatpush1.bf16.msra.mxu0 %v2302_v25  ;;  %1235 = vmatpush1.bf16.msra.mxu1 %v2304_v26  ;;  %v433_v25 = vld [vmem:[%s2745_s6 + $0x398] sm:$0xff] }
  0x5c   : > { %1195 = vmatprep.subr.bf16.mxu0 %v2295_v27  ;;  %1236 = vmatprep.subr.bf16.mxu1 %v2297_v28  ;;  %v437_v26 = vld [vmem:[%s2745_s6 + $0x3b8] sm:$0xff]  ;;  %v2366_v27 = vcombine.low %v440_v14, %v444_v15  ;;  %v2368_v28 = vcombine.low %v441_v16, %v445_v17  ;;  %v2311_v14 = vcombine.high %v384_v8, %v388_v9 }
  0x5d   : > { %1225 = vmatprep.mubr.bf16.mxu0 %v2795_v4  ;;  %1266 = vmatprep.mubr.bf16.mxu1 %v2795_v4  ;;  %v2280_v4 = vcombine.low %v353_v37, %v357_v38  ;;  %v2361_v30 = vcombine.high %v433_v25, %v437_v26  ;;  %v416_v37 = vld [vmem:[%s2745_s6 + $0x310] sm:$0xff]  ;;  %v2310_v16 = vcombine.low %v384_v8, %v388_v9 }
  0x5e   : > { %v420_v38 = vld [vmem:[%s2745_s6 + $0x330] sm:$0xff] }
  0x5f   : > { %1196 = vmatpush1.bf16.msra.mxu0 %v2294_v31  ;;  %1237 = vmatpush1.bf16.msra.mxu1 %v2296_v32  ;;  %v425_v31 = vld [vmem:[%s2745_s6 + $0x358] sm:$0xff]  ;;  %v2343_v43 = vcombine.high %v416_v37, %v420_v38 }
  0x60   : > { %1197 = vmatprep.subr.bf16.mxu0 %v2287_v33  ;;  %1238 = vmatprep.subr.bf16.mxu1 %v2289_v34  ;;  %v429_v32 = vld [vmem:[%s2745_s6 + $0x378] sm:$0xff]  ;;  %v2358_v33 = vcombine.low %v432_v23, %v436_v24  ;;  %v2360_v34 = vcombine.low %v433_v25, %v437_v26 }
  0x61   : > { %v2353_v36 = vcombine.high %v425_v31, %v429_v32 }
  0x63   : > { %1198 = vmatpush1.bf16.msra.mxu0 %v2286_v39  ;;  %1239 = vmatpush1.bf16.msra.mxu1 %v2288_v40  ;;  %v417_v39 = vld [vmem:[%s2745_s6 + $0x318] sm:$0xff] }
  0x64   : > { %1199 = vmatprep.subr.bf16.mxu0 %v2279_v41  ;;  %1240 = vmatprep.subr.bf16.mxu1 %v2281_v42  ;;  %v421_v40 = vld [vmem:[%s2745_s6 + $0x338] sm:$0xff]  ;;  %v2350_v41 = vcombine.low %v424_v57, %v428_v60  ;;  %v2352_v42 = vcombine.low %v425_v31, %v429_v32 }
  0x65   : > { %v2345_v44 = vcombine.high %v417_v39, %v421_v40 }
  0x67   : > { %1200 = vmatpush1.bf16.msra.mxu0 %v2278_v47  ;;  %1241 = vmatpush1.bf16.msra.mxu1 %v2280_v4  ;;  %v409_v47 = vld [vmem:[%s2745_s6 + $0x2d8] sm:$0xff] }
  0x68   : > { %1201 = vmatprep.subr.bf16.mxu0 %v2271_v49  ;;  %1242 = vmatprep.subr.bf16.mxu1 %v2273_v50  ;;  %v413_v4 = vld [vmem:[%s2745_s6 + $0x2f8] sm:$0xff]  ;;  %v2342_v49 = vcombine.low %v416_v37, %v420_v38  ;;  %v2344_v50 = vcombine.low %v417_v39, %v421_v40 }
  0x69   : > { %v2337_v52 = vcombine.high %v409_v47, %v413_v4 }
  0x6b   : > { %1202 = vmatpush1.bf16.msra.mxu0 %v2270_v55  ;;  %1243 = vmatpush1.bf16.msra.mxu1 %v2272_v56  ;;  %v401_v55 = vld [vmem:[%s2745_s6 + $0x298] sm:$0xff] }
  0x6c   : > { %1203 = vmatprep.subr.bf16.mxu0 %v2263_v58  ;;  %1244 = vmatprep.subr.bf16.mxu1 %v2265_v59  ;;  %v405_v56 = vld [vmem:[%s2745_s6 + $0x2b8] sm:$0xff]  ;;  %v2334_v58 = vcombine.low %v408_v45, %v412_v46  ;;  %v2336_v59 = vcombine.low %v409_v47, %v413_v4  ;;  %v316_v46 = vld [vmem:[#allocation2 + $0x8] sm:$0xff] }
  0x6d   : > { %v2329_v62 = vcombine.high %v401_v55, %v405_v56 }
  0x6f   : > { %1204 = vmatpush1.bf16.msra.mxu0 %v2262_v1  ;;  %1245 = vmatpush1.bf16.msra.mxu1 %v2264_v2  ;;  %v393_v1 = vld [vmem:[%s2745_s6 + $0x258] sm:$0xff] }
  0x70   : > { %1205 = vmatprep.subr.bf16.mxu0 %v2255_v3  ;;  %1246 = vmatprep.subr.bf16.mxu1 %v2257_v5  ;;  %v397_v2 = vld [vmem:[%s2745_s6 + $0x278] sm:$0xff]  ;;  %v2326_v3 = vcombine.low %v400_v53, %v404_v54  ;;  %v2328_v5 = vcombine.low %v401_v55, %v405_v56 }
  0x71   : > { %v2321_v7 = vcombine.high %v393_v1, %v397_v2 }
  0x73   : > { %1206 = vmatpush1.bf16.msra.mxu0 %v2254_v10  ;;  %1247 = vmatpush1.bf16.msra.mxu1 %v2256_v11  ;;  %v385_v10 = vld [vmem:[%s2745_s6 + $0x218] sm:$0xff] }
  0x74   : > { %1207 = vmatprep.subr.bf16.mxu0 %v2247_v12  ;;  %1248 = vmatprep.subr.bf16.mxu1 %v2249_v13  ;;  %v389_v11 = vld [vmem:[%s2745_s6 + $0x238] sm:$0xff]  ;;  %v2318_v12 = vcombine.low %v392_v63, %v396_v0  ;;  %v2320_v13 = vcombine.low %v393_v1, %v397_v2 }
  0x75   : > { %v2313_v15 = vcombine.high %v385_v10, %v389_v11  ;;  %v2312_v17 = vcombine.low %v385_v10, %v389_v11 }
  0x77   : > { %1208 = vmatpush1.bf16.msra.mxu0 %v2246_v18  ;;  %1249 = vmatpush1.bf16.msra.mxu1 %v2248_v19  ;;  %v2681_v18 = vmov 1983009808  }
  0x78   : > { %1209 = vmatprep.subr.bf16.mxu0 %v2367_v20  ;;  %1250 = vmatprep.subr.bf16.mxu1 %v2369_v21  ;;  %v1286_v19 = vunpack.c.l.s4 %v2681_v18 }
  0x7a   : > { %v1287_v20 = vunpack.c.0.s8 %v1286_v19 }
  0x7b   : > { %1210 = vmatpush2.bf16.msra.mxu0 %v2366_v27  ;;  %1251 = vmatpush2.bf16.msra.mxu1 %v2368_v28 }
  0x7c   : > { %1211 = vmatprep.subr.bf16.mxu0 %v2359_v29  ;;  %1252 = vmatprep.subr.bf16.mxu1 %v2361_v30  ;;  %v2906_v24 = vsub.s32 %v1287_v20, %v2772_v48 }
  0x7f   : > { %1212 = vmatpush2.bf16.msra.mxu0 %v2358_v33  ;;  %1253 = vmatpush2.bf16.msra.mxu1 %v2360_v34 }
  0x80   : > { %1213 = vmatprep.subr.bf16.mxu0 %v2351_v35  ;;  %1254 = vmatprep.subr.bf16.mxu1 %v2353_v36 }
  0x83   : > { %1214 = vmatpush2.bf16.msra.mxu0 %v2350_v41  ;;  %1255 = vmatpush2.bf16.msra.mxu1 %v2352_v42 }
  0x84   : > { %1215 = vmatprep.subr.bf16.mxu0 %v2343_v43  ;;  %1256 = vmatprep.subr.bf16.mxu1 %v2345_v44 }
  0x87   : > { %1216 = vmatpush2.bf16.msra.mxu0 %v2342_v49  ;;  %1257 = vmatpush2.bf16.msra.mxu1 %v2344_v50 }
  0x88   : > { %1217 = vmatprep.subr.bf16.mxu0 %v2335_v51  ;;  %1258 = vmatprep.subr.bf16.mxu1 %v2337_v52 }
  0x8b   : > { %1218 = vmatpush2.bf16.msra.mxu0 %v2334_v58  ;;  %1259 = vmatpush2.bf16.msra.mxu1 %v2336_v59 }
  0x8c   : > { %1219 = vmatprep.subr.bf16.mxu0 %v2327_v61  ;;  %1260 = vmatprep.subr.bf16.mxu1 %v2329_v62 }
  0x8f   : > { %1220 = vmatpush2.bf16.msra.mxu0 %v2326_v3  ;;  %1261 = vmatpush2.bf16.msra.mxu1 %v2328_v5 }
  0x90   : > { %1221 = vmatprep.subr.bf16.mxu0 %v2319_v6  ;;  %1262 = vmatprep.subr.bf16.mxu1 %v2321_v7 }
  0x93   : > { %1222 = vmatpush2.bf16.msra.mxu0 %v2318_v12  ;;  %1263 = vmatpush2.bf16.msra.mxu1 %v2320_v13 }
  0x94   : > { %1223 = vmatprep.subr.bf16.mxu0 %v2311_v14  ;;  %1264 = vmatprep.subr.bf16.mxu1 %v2313_v15 }
  0x97   : > { %1224 = vmatpush2.bf16.msra.mxu0 %v2310_v16  ;;  %1265 = vmatpush2.bf16.msra.mxu1 %v2312_v17 }
  0x9a   : > { %1226 = vmatmul.mubr.bf16.vlgmr.msra.gmra.mxu0 %v2839_v22  ;;  %1267 = vmatmul.mubr.bf16.vlgmr.msra.gmra.mxu1 %v2839_v22  ;;  %v315_v22 = vld [vmem:[#allocation2] sm:$0xff] }
 0x11a   : > { %v1145_v21 = vpop.f32.mrf.mxu0  ;;  %v1186_v23 = vpop.f32.mrf.mxu1 }
 0x11c   : > { %v1147_v25 = vpop.f32.mrf.mxu0  ;;  %v1188_v27 = vpop.f32.mrf.mxu1 }
 0x11d   : > { %v1283_v26 = vcombine.low %v1145_v21, %v1147_v25  ;;  %v1284_v28 = vcombine.low %v1186_v23, %v1188_v27 }
 0x11e   : > { %v1149_v29 = vpop.f32.mrf.mxu0  ;;  %v1190_v57 = vpop.f32.mrf.mxu1 }
 0x11f   : > { %v1291_v30 = vrot.slane %v1283_v26, %v2906_v24  ;;  %v1298_v60 = vrot.slane %v1284_v28, %v2906_v24 }
 0x120   : > { %v1150_v31 = vpop.f32.mrf.mxu0  ;;  %v1191_v32 = vpop.f32.mrf.mxu1 }
 0x121   : > { %v1299_v33 = vcombine.low %v1291_v30, %v1298_v60 }
 0x123   : > { %v1319_v34 = vadd.f32 %v1299_v33, %v315_v22 }
 0x125   : > { %1321 = vst [vmem:[#allocation2] sm:$0xff] %v1319_v34 }
 0x15a   : > { %v1227_v35 = vpop.f32.mrf.mxu0  ;;  %v1268_v36 = vpop.f32.mrf.mxu1 }
 0x15c   : > { %v1229_v37 = vpop.f32.mrf.mxu0  ;;  %v1270_v39 = vpop.f32.mrf.mxu1 }
 0x15d   : > { %v1300_v38 = vcombine.low %v1227_v35, %v1229_v37  ;;  %v1301_v40 = vcombine.low %v1268_v36, %v1270_v39 }
 0x15e   : > { %v1231_v41 = vpop.f32.mrf.mxu0  ;;  %v1272_v43 = vpop.f32.mrf.mxu1 }
 0x15f   : > { %v1308_v42 = vrot.slane %v1300_v38, %v2906_v24  ;;  %v1315_v44 = vrot.slane %v1301_v40, %v2906_v24 }
 0x160   : > { %v1232_v45 = vpop.f32.mrf.mxu0  ;;  %v1273_v47 = vpop.f32.mrf.mxu1 }
 0x161   : > { %v1316_v4 = vcombine.low %v1308_v42, %v1315_v44  ;;  %1326 = sbr.rel (%p2370_p7) target bundleno = 628 (0x274), region = 48 }
 0x163   : > { %v1320_v49 = vadd.f32 %v1316_v4, %v316_v46 }
 0x165   : > { %1322 = vst [vmem:[#allocation2 + $0x8] sm:$0xff] %v1320_v49 }
 0x166   : > { %v2563_v50 = vld [vmem:[%s3156_s3 + $0x78] sm:$0xff]   ;;  %v2567_v54 = vld [vmem:[%s3156_s3 + $0x70] sm:$0xff]   ;;  %v2571_v59 = vld [vmem:[%s3156_s3 + $0x68] sm:$0xff]   ;;  %v1333_v16 = vsub.s32 0, %v2772_v48  ;;  %v1337_v18 = vsub.s32 1, %v2772_v48  ;;  %v1341_v20 = vsub.s32 2, %v2772_v48 }
 0x167   : > { %v2564_v51 = vld [vmem:[%s3156_s3 + $0xf8] sm:$0xff]   ;;  %2441 = vmatprep.subr.bf16.mxu0 %v2563_v50  ;;  %v2568_v55 = vld [vmem:[%s3156_s3 + $0xf0] sm:$0xff]   ;;  %v2572_v61 = vld [vmem:[%s3156_s3 + $0xe8] sm:$0xff]   ;;  %v1345_v23 = vsub.s32 3, %v2772_v48  ;;  %v1349_v39 = vsub.s32 4, %v2772_v48  ;;  %v1353_v40 = vsub.s32 5, %v2772_v48 }
 0x168   : > { %v2565_v52 = vld [vmem:[%s3156_s3 + $0x38] sm:$0xff]   ;;  %2463 = vmatprep.subr.bf16.mxu1 %v2564_v51  ;;  %v2569_v56 = vld [vmem:[%s3156_s3 + $0x30] sm:$0xff]   ;;  %v2573_v62 = vld [vmem:[%s3156_s3 + $0x28] sm:$0xff]   ;;  %v1357_v43 = vsub.s32 6, %v2772_v48  ;;  %v1361_v44 = vsub.s32 7, %v2772_v48 }
 0x169   : > { %v2566_v53 = vld [vmem:[%s3156_s3 + $0xb8] sm:$0xff]   ;;  %2442 = vmatpush3.bf16.msra.mxu0 %v2565_v52  ;;  %v2570_v58 = vld [vmem:[%s3156_s3 + $0xb0] sm:$0xff]   ;;  %v2574_v63 = vld [vmem:[%s3156_s3 + $0xa8] sm:$0xff]  }
 0x16a   : > { %2464 = vmatpush3.bf16.msra.mxu1 %v2566_v53  ;;  %2443 = vmatprep.subr.bf16.mxu0 %v2567_v54  ;;  %v2575_v0 = vld [vmem:[%s3156_s3 + $0x60] sm:$0xff]   ;;  %v2579_v5 = vld [vmem:[%s3156_s3 + $0x58] sm:$0xff]   ;;  %v2583_v9 = vld [vmem:[%s3156_s3 + $0x50] sm:$0xff]  }
 0x16b   : > { %2465 = vmatprep.subr.bf16.mxu1 %v2568_v55  ;;  %v2576_v1 = vld [vmem:[%s3156_s3 + $0xe0] sm:$0xff]   ;;  %v2580_v6 = vld [vmem:[%s3156_s3 + $0xd8] sm:$0xff]   ;;  %v2584_v10 = vld [vmem:[%s3156_s3 + $0xd0] sm:$0xff]  }
 0x16c   : > { %v2577_v2 = vld [vmem:[%s3156_s3 + $0x20] sm:$0xff]   ;;  %v2581_v7 = vld [vmem:[%s3156_s3 + $0x18] sm:$0xff]   ;;  %v2585_v11 = vld [vmem:[%s3156_s3 + $0x10] sm:$0xff]  }
 0x16d   : > { %2444 = vmatpush3.bf16.msra.mxu0 %v2569_v56  ;;  %v2578_v3 = vld [vmem:[%s3156_s3 + $0xa0] sm:$0xff]   ;;  %v2582_v8 = vld [vmem:[%s3156_s3 + $0x98] sm:$0xff]   ;;  %v2586_v12 = vld [vmem:[%s3156_s3 + $0x90] sm:$0xff]  }
 0x16e   : > { %2466 = vmatpush3.bf16.msra.mxu1 %v2570_v58  ;;  %2445 = vmatprep.subr.bf16.mxu0 %v2571_v59  ;;  %v2587_v13 = vld [vmem:[%s3156_s3 + $0x48] sm:$0xff]   ;;  %v2591_v19 = vld [vmem:[%s3156_s3 + $0x40] sm:$0xff]   ;;  %v2595_v60 = vld [vmem:[%s3156_s3 + $0x178] sm:$0xff]  }
 0x16f   : > { %2467 = vmatprep.subr.bf16.mxu1 %v2572_v61  ;;  %v2588_v14 = vld [vmem:[%s3156_s3 + $0xc8] sm:$0xff]   ;;  %v2592_v21 = vld [vmem:[%s3156_s3 + $0xc0] sm:$0xff]   ;;  %v2596_v31 = vld [vmem:[%s3156_s3 + $0x1f8] sm:$0xff]  }
 0x170   : > { %v2589_v15 = vld [vmem:[%s3156_s3 + $0x8] sm:$0xff]   ;;  %v2593_v25 = vld [vmem:[%s3156_s3] sm:$0xff]   ;;  %v2597_v52 = vld [vmem:[%s3156_s3 + $0x138] sm:$0xff]  }
 0x171   : > { %2446 = vmatpush3.bf16.msra.mxu0 %v2573_v62  ;;  %v2590_v17 = vld [vmem:[%s3156_s3 + $0x88] sm:$0xff]   ;;  %v2594_v26 = vld [vmem:[%s3156_s3 + $0x80] sm:$0xff]   ;;  %v2599_v56 = vld [vmem:[%s3156_s3 + $0x170] sm:$0xff]  }
 0x172   : > { %2468 = vmatpush3.bf16.msra.mxu1 %v2574_v63  ;;  %2447 = vmatprep.subr.bf16.mxu0 %v2575_v0  ;;  %v1329_v27 = vld [vmem:[%s3155_s2] sm:$0xff]  ;;  %v2598_v58 = vld [vmem:[%s3156_s3 + $0x1b8] sm:$0xff]   ;;  %v2600_v59 = vld [vmem:[%s3156_s3 + $0x1f0] sm:$0xff]  }
 0x173   : > { %2469 = vmatprep.subr.bf16.mxu1 %v2576_v1  ;;  %v1334_v28 = vrot.slane %v1329_v27, %v1333_v16  ;;  %v1338_v29 = vrot.slane %v1329_v27, %v1337_v18  ;;  %v1342_v30 = vrot.slane %v1329_v27, %v1341_v20  ;;  %v1346_v57 = vrot.slane %v1329_v27, %v1345_v23  ;;  %v1327_v35 = vld [vmem:[#allocation2] sm:$0xff]  ;;  %v2601_v61 = vld [vmem:[%s3156_s3 + $0x130] sm:$0xff]   ;;  %v2603_v0 = vld [vmem:[%s3156_s3 + $0x168] sm:$0xff]  }
 0x174   : > { %v1350_v4 = vrot.slane %v1329_v27, %v1349_v39  ;;  %v1354_v49 = vrot.slane %v1329_v27, %v1353_v40  ;;  %v1358_v53 = vrot.slane %v1329_v27, %v1357_v43  ;;  %v1362_v54 = vrot.slane %v1329_v27, %v1361_v44  ;;  %v2602_v1 = vld [vmem:[%s3156_s3 + $0x1b0] sm:$0xff]   ;;  %v2613_v16 = vld [vmem:[%s3156_s3 + $0x118] sm:$0xff]   ;;  %v2619_v27 = vld [vmem:[%s3156_s3 + $0x148] sm:$0xff]  }
 0x175   : > { %2448 = vmatpush3.bf16.msra.mxu0 %v2577_v2  ;;  %v1363_v22 = vcombine.low %v1334_v28, %v1338_v29  ;;  %v1364_v32 = vcombine.low %v1342_v30, %v1346_v57  ;;  %v2604_v2 = vld [vmem:[%s3156_s3 + $0x1e8] sm:$0xff]   ;;  %v2615_v18 = vld [vmem:[%s3156_s3 + $0x150] sm:$0xff]  }
 0x176   : > { %2470 = vmatpush3.bf16.msra.mxu1 %v2578_v3  ;;  %2449 = vmatprep.subr.bf16.mxu0 %v2579_v5  ;;  %v1380_v62 = vcombine.low %v1350_v4, %v1354_v49  ;;  %v1381_v63 = vcombine.low %v1358_v53, %v1362_v54  ;;  %v2605_v3 = vld [vmem:[%s3156_s3 + $0x128] sm:$0xff]   ;;  %v2617_v23 = vld [vmem:[%s3156_s3 + $0x110] sm:$0xff]   ;;  %v2371_v4 = vld [vmem:[%s3157_s4] ss:$0 sm:$0xff] }
 0x177   : > { %2471 = vmatprep.subr.bf16.mxu1 %v2580_v6  ;;  %v1371_v33 = vrot.slane %v1363_v22, %v2906_v24  ;;  %v1378_v34 = vrot.slane %v1364_v32, %v2906_v24  ;;  %v2618_v28 = vld [vmem:[%s3156_s3 + $0x190] sm:$0xff]   ;;  %v2620_v57 = vld [vmem:[%s3156_s3 + $0x1c8] sm:$0xff]   ;;  %v2623_v32 = vld [vmem:[%s3156_s3 + $0x140] sm:$0xff]  }
 0x178   : > { %v1388_v5 = vrot.slane %v1380_v62, %v2906_v24  ;;  %v1395_v6 = vrot.slane %v1381_v63, %v2906_v24 }
 0x179   : > { %2450 = vmatpush3.bf16.msra.mxu0 %v2581_v7  ;;  %v1379_v36 = vcombine.low %v1371_v33, %v1378_v34  ;;  %v2607_v7 = vld [vmem:[%s3156_s3 + $0x160] sm:$0xff]  }
 0x17a   : > { %2472 = vmatpush3.bf16.msra.mxu1 %v2582_v8  ;;  %2451 = vmatprep.subr.bf16.mxu0 %v2583_v9  ;;  %v2606_v8 = vld [vmem:[%s3156_s3 + $0x1a8] sm:$0xff]   ;;  %v2608_v9 = vld [vmem:[%s3156_s3 + $0x1e0] sm:$0xff]  }
 0x17b   : > { %2473 = vmatprep.subr.bf16.mxu1 %v2584_v10  ;;  %v1399_v37 = vadd.f32 %v1379_v36, %v1327_v35  ;;  %v2609_v10 = vld [vmem:[%s3156_s3 + $0x120] sm:$0xff]  }
 0x17c   : > { %v2624_v34 = vld [vmem:[%s3156_s3 + $0x1c0] sm:$0xff]  }
 0x17d   : > { %2452 = vmatpush3.bf16.msra.mxu0 %v2585_v11  ;;  %v1401_v38 = vmax.f32 %v1399_v37, 0.0  ;;  %v1396_v11 = vcombine.low %v1388_v5, %v1395_v6  ;;  %v2625_v35 = vld [vmem:[%s3156_s3 + $0x100] sm:$0xff]  }
 0x17e   : > { %2474 = vmatpush3.bf16.msra.mxu1 %v2586_v12  ;;  %2453 = vmatprep.subr.bf16.mxu0 %v2587_v13  ;;  %v2611_v12 = vld [vmem:[%s3156_s3 + $0x158] sm:$0xff]   ;;  %v2610_v13 = vld [vmem:[%s3156_s3 + $0x1a0] sm:$0xff]  }
 0x17f   : > { %2475 = vmatprep.subr.bf16.mxu1 %v2588_v14  ;;  %v1412_v41 = vrot.slane %v1401_v38, %v2906_v24  ;;  %v1405_v42 = vcombine.high %v1401_v38, %v1401_v38  ;;  %v2612_v14 = vld [vmem:[%s3156_s3 + $0x1d8] sm:$0xff]   ;;  %v2626_v36 = vld [vmem:[%s3156_s3 + $0x180] sm:$0xff]  }
 0x181   : > { %2454 = vmatpush3.bf16.msra.mxu0 %v2589_v15  ;;  %v1420_v45 = vcombine.high %v1412_v41, %v1412_v41  ;;  %v1419_v46 = vrot.slane %v1405_v42, %v2906_v24  ;;  %v1447_v47 = vpack.c.bf16 %v1412_v41, %v1412_v41  ;;  %v1328_v15 = vld [vmem:[#allocation2 + $0x8] sm:$0xff] }
 0x182   : > { %2476 = vmatpush3.bf16.msra.mxu1 %v2590_v17  ;;  %2455 = vmatprep.subr.bf16.mxu0 %v2591_v19  ;;  %v1400_v17 = vadd.f32 %v1396_v11, %v1328_v15  ;;  %v2614_v19 = vld [vmem:[%s3156_s3 + $0x198] sm:$0xff]  }
 0x183   : > { %2477 = vmatprep.subr.bf16.mxu1 %v2592_v21  ;;  %v1448_v50 = vpack.c.bf16 %v1420_v45, %v1420_v45  ;;  %v1421_v51 = vcombine.high %v1419_v46, %v1419_v46  ;;  %v1449_v55 = vpack.c.bf16 %v1419_v46, %v1419_v46  ;;  %v2616_v21 = vld [vmem:[%s3156_s3 + $0x1d0] sm:$0xff]  }
 0x184   : > { %v1402_v20 = vmax.f32 %v1400_v17, 0.0 }
 0x185   : > { %2456 = vmatpush3.bf16.msra.mxu0 %v2593_v25  ;;  %2006 = vmatprep.mubr.bf16.mxu0 %v1448_v50  ;;  %v1450_v48 = vpack.c.bf16 %v1421_v51, %v1421_v51 }
 0x186   : > { %2478 = vmatpush3.bf16.msra.mxu1 %v2594_v26  ;;  %2485 = vmatprep.subr.bf16.mxu0 %v2595_v60  ;;  %v1429_v25 = vrot.slane %v1402_v20, %v2906_v24  ;;  %v1422_v26 = vcombine.high %v1402_v20, %v1402_v20  ;;  %v2621_v60 = vld [vmem:[%s3156_s3 + $0x108] sm:$0xff]  }
 0x187   : > { %2507 = vmatprep.subr.bf16.mxu1 %v2596_v31  ;;  %2046 = vmatprep.mubr.bf16.mxu1 %v1450_v48 }
 0x188   : > { %2007 = vmatmul.mubr.bf16.vlgmr.msra.gmra.mxu0 %v1447_v47  ;;  %v1437_v29 = vcombine.high %v1429_v25, %v1429_v25  ;;  %v1436_v30 = vrot.slane %v1422_v26, %v2906_v24  ;;  %v2622_v24 = vld [vmem:[%s3156_s3 + $0x188] sm:$0xff]   ;;  %v1451_v37 = vpack.c.bf16 %v1429_v25, %v1429_v25 }
 0x189   : > { %2486 = vmatpush3.bf16.msra.mxu0 %v2597_v52  ;;  %2047 = vmatmul.mubr.bf16.vlgmr.msra.gmra.mxu1 %v1449_v55 }
 0x18a   : > { %2487 = vmatprep.subr.bf16.mxu0 %v2599_v56  ;;  %2508 = vmatpush3.bf16.msra.mxu1 %v2598_v58  ;;  %v1452_v31 = vpack.c.bf16 %v1437_v29, %v1437_v29  ;;  %v1438_v22 = vcombine.high %v1436_v30, %v1436_v30  ;;  %v1453_v38 = vpack.c.bf16 %v1436_v30, %v1436_v30 }
 0x18b   : > { %2509 = vmatprep.subr.bf16.mxu1 %v2600_v59 }
 0x18c   : > { %2086 = vmatprep.mubr.bf16.mxu0 %v1452_v31  ;;  %v1454_v33 = vpack.c.bf16 %v1438_v22, %v1438_v22 }
 0x18d   : > { %2488 = vmatpush3.bf16.msra.mxu0 %v2601_v61 }
 0x18e   : > { %2489 = vmatprep.subr.bf16.mxu0 %v2603_v0  ;;  %2510 = vmatpush3.bf16.msra.mxu1 %v2602_v1 }
 0x18f   : > { %2511 = vmatprep.subr.bf16.mxu1 %v2604_v2  ;;  %2126 = vmatprep.mubr.bf16.mxu1 %v1454_v33 }
 0x191   : > { %2490 = vmatpush3.bf16.msra.mxu0 %v2605_v3 }
 0x192   : > { %2491 = vmatprep.subr.bf16.mxu0 %v2607_v7  ;;  %2512 = vmatpush3.bf16.msra.mxu1 %v2606_v8 }
 0x193   : > { %2513 = vmatprep.subr.bf16.mxu1 %v2608_v9 }
 0x195   : > { %2492 = vmatpush3.bf16.msra.mxu0 %v2609_v10 }
 0x196   : > { %2493 = vmatprep.subr.bf16.mxu0 %v2611_v12  ;;  %2514 = vmatpush3.bf16.msra.mxu1 %v2610_v13 }
 0x197   : > { %2515 = vmatprep.subr.bf16.mxu1 %v2612_v14 }
 0x199   : > { %2494 = vmatpush3.bf16.msra.mxu0 %v2613_v16 }
 0x19a   : > { %2495 = vmatprep.subr.bf16.mxu0 %v2615_v18  ;;  %2516 = vmatpush3.bf16.msra.mxu1 %v2614_v19 }
 0x19b   : > { %2517 = vmatprep.subr.bf16.mxu1 %v2616_v21 }
 0x19d   : > { %2496 = vmatpush3.bf16.msra.mxu0 %v2617_v23 }
 0x19e   : > { %2497 = vmatprep.subr.bf16.mxu0 %v2619_v27  ;;  %2518 = vmatpush3.bf16.msra.mxu1 %v2618_v28 }
 0x19f   : > { %2519 = vmatprep.subr.bf16.mxu1 %v2620_v57 }
 0x1a1   : > { %2498 = vmatpush3.bf16.msra.mxu0 %v2621_v60 }
 0x1a2   : > { %2499 = vmatprep.subr.bf16.mxu0 %v2623_v32  ;;  %2520 = vmatpush3.bf16.msra.mxu1 %v2622_v24 }
 0x1a3   : > { %2521 = vmatprep.subr.bf16.mxu1 %v2624_v34 }
 0x1a5   : > { %2500 = vmatpush3.bf16.msra.mxu0 %v2625_v35 }
 0x1a6   : > { %2522 = vmatpush3.bf16.msra.mxu1 %v2626_v36 }
 0x1a8   : > { %2087 = vmatmul.mubr.bf16.vlgmr.msra.gmra.mxu0 %v1451_v37 }
 0x1a9   : > { %2127 = vmatmul.mubr.bf16.vlgmr.msra.gmra.mxu1 %v1453_v38 }
 0x248   : > { %v2457_v39 = vpop.f32.mrf.mxu0 }
 0x249   : > { %v2479_v40 = vpop.f32.mrf.mxu1 }
 0x24a   : > { %v2458_v41 = vpop.f32.mrf.mxu0 }
 0x24b   : > { %v2480_v42 = vpop.f32.mrf.mxu1  ;;  %v2459_v47 = vadd.f32 %v2458_v41, %v2457_v39 }
 0x24c   : > { %v2460_v43 = vpop.f32.mrf.mxu0  ;;  %v2481_v50 = vadd.f32 %v2480_v42, %v2479_v40 }
 0x24d   : > { %v2482_v44 = vpop.f32.mrf.mxu1  ;;  %v2009_v49 = vadd.f32 %v2459_v47, %v2371_v4 }
 0x24e   : > { %v2461_v45 = vpop.f32.mrf.mxu0 }
 0x24f   : > { %v2483_v46 = vpop.f32.mrf.mxu1  ;;  %v2049_v54 = vadd.f32 %v2481_v50, %v2009_v49 }
 0x268   : > { %v2501_v51 = vpop.f32.mrf.mxu0 }
 0x269   : > { %v2523_v52 = vpop.f32.mrf.mxu1 }
 0x26a   : > { %v2502_v53 = vpop.f32.mrf.mxu0 }
 0x26b   : > { %v2503_v55 = vadd.f32 %v2502_v53, %v2501_v51  ;;  %v2524_v56 = vpop.f32.mrf.mxu1 }
 0x26c   : > { %v2504_v48 = vpop.f32.mrf.mxu0  ;;  %v2525_v59 = vadd.f32 %v2524_v56, %v2523_v52 }
 0x26d   : > { %v2089_v58 = vadd.f32 %v2503_v55, %v2049_v54  ;;  %v2526_v61 = vpop.f32.mrf.mxu1 }
 0x26e   : > { %v2505_v62 = vpop.f32.mrf.mxu0 }
 0x26f   : > { %v2129_v63 = vadd.f32 %v2525_v59, %v2089_v58  ;;  %v2527_v0 = vpop.f32.mrf.mxu1 }
 0x271   : > { %v2134_v1 = vmax.f32 %v2129_v63, 0.0 }
 0x273   : > { %2135 = vst [vmem:[#allocation3] sm:$0x3] %v2134_v1 }
 0x274 PF: > { %p3129_p8 = scmp.eq.s32.totalorder %s2231_s21, 1  ;;  %s2682_s16 = smov [#allocation3]  }
 0x275   : > { %s2145_s17 = sshll.u32 %s2682_s16, 4  ;;  %s2146_s17 = int_to_ptr.vmem [resolvable:$true] %s2145_s17 }
 0x276   : > { %s2627_s18 = scalar_lea.vmem %s2146_s17, 32  ;;  %p2634_p12 = scmp.lt.s32.totalorder %s2146_s17, %s2146_s17 }
 0x277   : > { %p2628_p9 = scmp.ne.s32.totalorder %s2146_s17, %s2627_s18  ;;  %p2635_p13 = scmp.lt.s32.totalorder %s2627_s18, %s2627_s18 }
 0x279   : > { %p2629_p10 = pnand %p2628_p9, %p3129_p8  ;;  %p2636_p0 = por %p2635_p13, %p2634_p12 }
 0x27b   : > { %p2630_p11 = pneg %p2629_p10 }
 0x27d   : > { %p2637_p1 = pnand %p2636_p0, %p2630_p11 }
 0x27f   : > { %2640 = shalt.err (!%p2637_p1)
}
 0x280   : > { %2530 = dma.vmem_to_hbm [thread:$0]  (%p3129_p8), %s2146_s17, 32, %s3158_s5, [#allocation4]  }
 0x281   : > { %2664 = dma.done.wait (%p3129_p8), [#allocation4], 32  }
 0x282   : > { %2666 = vsyncadd (%p3129_p8), [#allocation4], 4294967264 }
 0x283 PF: > { %s16_s20 = sadd.s32 1, %s2677_s20   ;;  %s3160_s18 = smov %s2673_s19 }
 0x284   : > { %p13_p2 = scmp.ge.s32.totalorder %s16_s20, 4   ;;  %s3161_s19 = smov %s3163_s22 }
 0x286   :  { %15 = sbr.rel (!%p13_p2) target bundleno = 2 (0x2), region = 82 }
 0x28b   :  { %2158 = vsyncpa [#allocation4], 1 }
 0x28c   :  { %2160 = vsyncpa [#allocation4 + $0x1], 1 }

</bundles_post_ra>
